<compile_context>
chip_gen: v6e
topology: v6e:2x2x1
jax: 0.10.0
libtpu: 0.0.40
codegen_flags: <defaults>
</compile_context>

<pallas_src>
import functools
import math

import jax
import jax.numpy as jnp
from jax import lax
from jax.experimental import pallas as pl
from jax.experimental.pallas import tpu as pltpu

LN_EPS = 1e-5
NEG_BIG = -1e30                      # finite mask fill -> no -inf arithmetic


# ------------------------------ per-chip config ------------------------------

def _chip_config():
    kind = ""
    try:
        kind = jax.devices()[0].device_kind.lower()
    except Exception:
        pass
    if "v7" in kind:       # 64 MiB physical VMEM: smaller tiles, bf16 exp
        return dict(tq=256, tq_attn=128, tv=1024, ff_tile=1024,
                    vmem=56 * 1024 * 1024, bf16_exp=True)
    if "v6" in kind:       # 128 MiB VMEM, bf16 VPU/EUP
        return dict(tq=512, tq_attn=256, tv=2048, ff_tile=1024,
                    vmem=100 * 1024 * 1024, bf16_exp=True)
    if "v5" in kind or "v4" in kind:   # 128 MiB VMEM, no bf16 VPU/EUP
        return dict(tq=512, tq_attn=256, tv=2048, ff_tile=1024,
                    vmem=100 * 1024 * 1024, bf16_exp=False)
    # unknown backend: conservative defaults
    return dict(tq=256, tq_attn=128, tv=512, ff_tile=512,
                vmem=None, bf16_exp=False)


CFG = _chip_config()


# ------------------------------ small helpers ------------------------------

def _round_up(x, m):
    return (x + m - 1) // m * m


def _divisor_tile(n, target, multiple):
    """Largest divisor of n that is a multiple of `multiple` and <= target."""
    if n <= target:
        return n
    t = (target // multiple) * multiple
    while t >= multiple:
        if n % t == 0:
            return t
        t -= multiple
    return n


def _choose_vocab_tile(V, target):
    Vp128 = _round_up(V, 128)
    TV = min(target, Vp128)
    Vp = _round_up(V, TV)
    return TV, Vp


def _const_spec(a):
    """Whole-array block whose index never changes -> single-buffered."""
    zero = (0,) * a.ndim
    idx = lambda *_, z=zero: z
    try:
        return pl.BlockSpec(a.shape, idx, pipeline_mode=pl.Buffered(1))
    except Exception:                          # older jax without pipeline_mode
        return pl.BlockSpec(a.shape, idx)


def _vocab_w_spec(w, TV):
    idx = lambda vj, b, qi: (0, vj)
    try:
        return pl.BlockSpec((w.shape[0], TV), idx, pipeline_mode=pl.Buffered(1))
    except Exception:
        return pl.BlockSpec((w.shape[0], TV), idx)


def _cparams(sem):
    kw = dict(dimension_semantics=sem)
    if CFG["vmem"] is not None:
        kw["vmem_limit_bytes"] = CFG["vmem"]
    return pltpu.CompilerParams(**kw)


def _layer_norm_f32(x, g, b):
    mu = jnp.mean(x, axis=-1, keepdims=True)
    var = jnp.mean((x - mu) ** 2, axis=-1, keepdims=True)
    return (x - mu) * lax.rsqrt(var + LN_EPS) * g + b


def _gelu_new(x):
    # GPT-2 "gelu_new" (tanh approximation), in fp32
    return 0.5 * x * (1.0 + jnp.tanh(
        math.sqrt(2.0 / math.pi) * (x + 0.044715 * x * x * x)))


# --------------------------------- kernels ----------------------------------

def _ln_qkv_kernel(x_ref, g_ref, b_ref, wq_ref, bq_ref, wk_ref, bk_ref,
                   wv_ref, bv_ref, q_ref, k_ref, v_ref):
    x = x_ref[0].astype(jnp.float32)                       # (TQ, H)
    h = _layer_norm_f32(x, g_ref[...], b_ref[...]).astype(jnp.bfloat16)
    q_ref[0] = (jnp.dot(h, wq_ref[...], preferred_element_type=jnp.float32)
                + bq_ref[...]).astype(q_ref.dtype)
    k_ref[0] = (jnp.dot(h, wk_ref[...], preferred_element_type=jnp.float32)
                + bk_ref[...]).astype(k_ref.dtype)
    v_ref[0] = (jnp.dot(h, wv_ref[...], preferred_element_type=jnp.float32)
                + bv_ref[...]).astype(v_ref.dtype)


def _attn_kernel(x_ref, q_ref, k_ref, v_ref, mask_ref, wo_ref, bo_ref, o_ref,
                 *, bf16_exp):
    # x_ref: (1, TQ, H) residual; q_ref: (1, nh, TQ, hd) (pre-scaled by 1/sqrt(hd))
    # k_ref/v_ref: (1, nh, S, hd); mask_ref: (1, 1, S); wo_ref: (nh, hd, H)
    TQ = q_ref.shape[2]
    S = k_ref.shape[2]
    q = q_ref[0]
    k = k_ref[0]
    v = v_ref[0]
    s = jnp.einsum("hqd,hkd->hqk", q, k,
                   preferred_element_type=jnp.float32)     # (nh, TQ, S)
    # combined causal + key-padding mask, single where with a FINITE fill.
    row = pl.program_id(1) * TQ + lax.broadcasted_iota(jnp.int32, (TQ, S), 0)
    col = lax.broadcasted_iota(jnp.int32, (TQ, S), 1)
    key_ok = mask_ref[0] > 0.5                             # (1, S)
    valid = (row >= col) & key_ok                          # (TQ, S)
    s = jnp.where(valid[None, :, :], s, NEG_BIG)
    m = jnp.max(s, axis=-1, keepdims=True)
    z = s - m
    if bf16_exp:                                           # v6e / v7x: bf16 EUP
        p = jnp.exp(z.astype(jnp.bfloat16))
        l = jnp.sum(p.astype(jnp.float32), axis=-1, keepdims=True)
    else:                                                  # v5e: fp32 EUP only
        pf = jnp.exp(z)
        l = jnp.sum(pf, axis=-1, keepdims=True)
        p = pf.astype(jnp.bfloat16)
    inv = pl.reciprocal(l, approx=True)                    # (nh, TQ, 1)
    ctx = jnp.einsum("hqk,hkd->hqd", p, v,
                     preferred_element_type=jnp.float32) * inv   # (nh, TQ, hd)
    # per-head output projection: the head merge happens inside this batched
    # matmul (no in-kernel transpose), then a cheap leading-axis reduction.
    proj = jnp.einsum("hqd,hdo->hqo", ctx.astype(jnp.bfloat16), wo_ref[...],
                      preferred_element_type=jnp.float32)        # (nh, TQ, H)
    attn = jnp.sum(proj, axis=0) + bo_ref[...]                   # (TQ, H)
    o_ref[0] = (x_ref[0].astype(jnp.float32) + attn).astype(o_ref.dtype)


def _mlp_kernel(x1_ref, g2_ref, b2_ref, wfc_ref, bfc_ref, wpj_ref, bpj_ref,
                o_ref, h2_sc, acc_sc):
    # grid = (B, nQ, nF); FF (=4H) axis is a reduction -> accumulator scratch.
    f = pl.program_id(2)

    @pl.when(f == 0)
    def _():
        x1 = x1_ref[0].astype(jnp.float32)
        h2_sc[...] = _layer_norm_f32(x1, g2_ref[...],
                                     b2_ref[...]).astype(jnp.bfloat16)
        acc_sc[...] = jnp.zeros_like(acc_sc)

    ff = jnp.dot(h2_sc[...], wfc_ref[...],
                 preferred_element_type=jnp.float32) + bfc_ref[...]
    ff = _gelu_new(ff)
    acc_sc[...] += jnp.dot(ff.astype(jnp.bfloat16), wpj_ref[...],
                           preferred_element_type=jnp.float32)

    @pl.when(f == pl.num_programs(2) - 1)
    def _():
        o_ref[0] = (x1_ref[0].astype(jnp.float32) + acc_sc[...]
                    + bpj_ref[...]).astype(o_ref.dtype)


def _lnf_kernel(x_ref, g_ref, b_ref, o_ref):
    x = x_ref[0].astype(jnp.float32)
    o_ref[0] = _layer_norm_f32(x, g_ref[...], b_ref[...]).astype(o_ref.dtype)


def _lm_head_kernel(x_ref, w_ref, o_ref):
    o_ref[0] = jnp.dot(x_ref[0], w_ref[...],
                       preferred_element_type=jnp.float32).astype(o_ref.dtype)


# --------------------------------- wrappers ----------------------------------

def transformer_layer(h, mask, lp, num_heads, TQ, TQA):
    B, S, H = h.shape
    hd = H // num_heads
    nQ = S // TQ
    nQA = S // TQA

    # --- LN1 + Q/K/V projections (sequence-tiled, lane-dense outputs) ---
    q, k, v = pl.pallas_call(
        _ln_qkv_kernel,
        out_shape=[jax.ShapeDtypeStruct((B, S, H), jnp.bfloat16)] * 3,
        grid=(B, nQ),
        in_specs=[pl.BlockSpec((1, TQ, H), lambda b, qi: (b, qi, 0)),
                  _const_spec(lp["ln1_g"]), _const_spec(lp["ln1_b"]),
                  _const_spec(lp["w_q"]), _const_spec(lp["b_q"]),
                  _const_spec(lp["w_k"]), _const_spec(lp["b_k"]),
                  _const_spec(lp["w_v"]), _const_spec(lp["b_v"])],
        out_specs=[pl.BlockSpec((1, TQ, H), lambda b, qi: (b, qi, 0))] * 3,
        compiler_params=_cparams(("parallel", "parallel")),
    )(h, lp["ln1_g"], lp["ln1_b"], lp["w_q"], lp["b_q"],
      lp["w_k"], lp["b_k"], lp["w_v"], lp["b_v"])

    # TODO(synk): head split kept as XLA transposes (layout plumbing); an
    # in-kernel (TQ,H)->(nh,TQ,hd) relayout would also remove these HBM round
    # trips but relies on Mosaic relayout support for mid-axis batched einsums.
    def to_heads(t):
        return t.reshape(B, S, num_heads, hd).transpose(0, 2, 1, 3)

    qh, kh, vh = to_heads(q), to_heads(k), to_heads(v)

    # --- attention, batched over heads, fused output proj + residual ---
    # TODO(synk): for very long S a kv-tiled online softmax would replace the
    # full (nh, TQA, S) score tile; at GPT-2 contexts it fits VMEM.
    attn_kernel = functools.partial(_attn_kernel, bf16_exp=CFG["bf16_exp"])
    x1 = pl.pallas_call(
        attn_kernel,
        out_shape=jax.ShapeDtypeStruct((B, S, H), jnp.bfloat16),
        grid=(B, nQA),
        in_specs=[pl.BlockSpec((1, TQA, H), lambda b, qi: (b, qi, 0)),
                  pl.BlockSpec((1, num_heads, TQA, hd),
                               lambda b, qi: (b, 0, qi, 0)),
                  pl.BlockSpec((1, num_heads, S, hd),
                               lambda b, qi: (b, 0, 0, 0)),
                  pl.BlockSpec((1, num_heads, S, hd),
                               lambda b, qi: (b, 0, 0, 0)),
                  pl.BlockSpec((1, 1, S), lambda b, qi: (b, 0, 0)),
                  _const_spec(lp["w_o_h"]), _const_spec(lp["b_o"])],
        out_specs=pl.BlockSpec((1, TQA, H), lambda b, qi: (b, qi, 0)),
        compiler_params=_cparams(("parallel", "parallel")),
    )(h, qh, kh, vh, mask, lp["w_o_h"], lp["b_o"])

    # --- LN2 + MLP (FF axis tiled as a reduction) + residual ---
    FF = lp["w_fc"].shape[1]
    TF = _divisor_tile(FF, CFG["ff_tile"], 128)
    nF = FF // TF
    out = pl.pallas_call(
        _mlp_kernel,
        out_shape=jax.ShapeDtypeStruct((B, S, H), jnp.bfloat16),
        grid=(B, nQ, nF),
        in_specs=[pl.BlockSpec((1, TQ, H), lambda b, qi, f: (b, qi, 0)),
                  _const_spec(lp["ln2_g"]), _const_spec(lp["ln2_b"]),
                  pl.BlockSpec((H, TF), lambda b, qi, f: (0, f)),
                  pl.BlockSpec((1, TF), lambda b, qi, f: (0, f)),
                  pl.BlockSpec((TF, H), lambda b, qi, f: (f, 0)),
                  _const_spec(lp["b_proj"])],
        out_specs=pl.BlockSpec((1, TQ, H), lambda b, qi, f: (b, qi, 0)),
        scratch_shapes=[pltpu.VMEM((TQ, H), jnp.bfloat16),
                        pltpu.VMEM((TQ, H), jnp.float32)],
        compiler_params=_cparams(("parallel", "parallel", "arbitrary")),
    )(x1, lp["ln2_g"], lp["ln2_b"], lp["w_fc"], lp["b_fc"],
      lp["w_proj"], lp["b_proj"])
    return out


def lm_head(h, lnf_g, lnf_b, wte_T, vocab_size, TQ):
    B, S, H = h.shape
    Vp = wte_T.shape[1]
    TV, _ = _choose_vocab_tile(vocab_size, CFG["tv"])
    nQ, nV = S // TQ, Vp // TV

    # final LayerNorm hoisted OUT of the vocab loop (computed exactly once)
    hn = pl.pallas_call(
        _lnf_kernel,
        out_shape=jax.ShapeDtypeStruct((B, S, H), jnp.bfloat16),
        grid=(B, nQ),
        in_specs=[pl.BlockSpec((1, TQ, H), lambda b, qi: (b, qi, 0)),
                  _const_spec(lnf_g), _const_spec(lnf_b)],
        out_specs=pl.BlockSpec((1, TQ, H), lambda b, qi: (b, qi, 0)),
        compiler_params=_cparams(("parallel", "parallel")),
    )(h, lnf_g, lnf_b)

    logits = pl.pallas_call(
        _lm_head_kernel,
        out_shape=jax.ShapeDtypeStruct((B, S, Vp), jnp.bfloat16),
        grid=(nV, B, nQ),     # vocab outermost: weight tile resident across (B, nQ)
        in_specs=[pl.BlockSpec((1, TQ, H), lambda vj, b, qi: (b, qi, 0)),
                  _vocab_w_spec(wte_T, TV)],
        out_specs=pl.BlockSpec((1, TQ, TV), lambda vj, b, qi: (b, qi, vj)),
        compiler_params=_cparams(("arbitrary", "parallel", "parallel")),
    )(hn, wte_T)
    return logits[..., :vocab_size] if Vp != vocab_size else logits


def gpt_lm_forward(input_ids, attention_mask, params, num_heads):
    B, S = input_ids.shape
    V, H = params["wte"].shape
    TQ = _divisor_tile(S, CFG["tq"], 8)
    TQA = _divisor_tile(S, CFG["tq_attn"], 8)
    # Embedding gather + position embedding (XLA glue), residual stream in bf16.
    h = params["wte"][input_ids] + params["wpe"][:S][None, :, :]
    h = h.astype(jnp.bfloat16)
    # TODO(synk): GPT-2 dropout layers omitted (deterministic / eval-mode forward).
    mask = attention_mask.astype(jnp.float32).reshape(B, 1, S)
    for lp in params["layers"]:
        h = transformer_layer(h, mask, lp, num_heads, TQ, TQA)
    # use_cache only affects HF's cached K/V, not the returned logits ([0]).
    return lm_head(h, params["ln_f_g"], params["ln_f_b"], params["wte_T"],
                   V, TQ)


# --------------------------- params (canonical + prepared) -------------------

def init_params(key, vocab, max_seq, hidden, num_layers):
    def nrm(k, shape):
        return 0.02 * jax.random.normal(k, shape, dtype=jnp.float32)

    keys = iter(jax.random.split(key, 2 + 4 * num_layers))
    params = {
        "wte": nrm(next(keys), (vocab, hidden)),
        "wpe": nrm(next(keys), (max_seq, hidden)),
        "ln_f_g": jnp.ones((1, hidden), jnp.float32),
        "ln_f_b": jnp.zeros((1, hidden), jnp.float32),
        "layers": [],
    }
    for _ in range(num_layers):
        params["layers"].append({
            "ln1_g": jnp.ones((1, hidden), jnp.float32),
            "ln1_b": jnp.zeros((1, hidden), jnp.float32),
            "w_qkv": nrm(next(keys), (hidden, 3 * hidden)),
            "b_qkv": jnp.zeros((1, 3 * hidden), jnp.float32),
            "w_o":   nrm(next(keys), (hidden, hidden)),
            "b_o":   jnp.zeros((1, hidden), jnp.float32),
            "ln2_g": jnp.ones((1, hidden), jnp.float32),
            "ln2_b": jnp.zeros((1, hidden), jnp.float32),
            "w_fc":  nrm(next(keys), (hidden, 4 * hidden)),
            "b_fc":  jnp.zeros((1, 4 * hidden), jnp.float32),
            "w_proj": nrm(next(keys), (4 * hidden, hidden)),
            "b_proj": jnp.zeros((1, hidden), jnp.float32),
        })
    return params


def prepare_params(raw, num_heads):
    """One-time conversion to kernel-ready layout: bf16 matmul weights, softmax
    scale folded into q-projection, per-head w_o, transposed/padded LM head."""
    V, H = raw["wte"].shape
    hd = H // num_heads
    scale = 1.0 / math.sqrt(hd)
    TV, Vp = _choose_vocab_tile(V, CFG["tv"])
    wte_T = jnp.zeros((H, Vp), jnp.bfloat16)
    wte_T = wte_T.at[:, :V].set(raw["wte"].T.astype(jnp.bfloat16))
    out = {
        "wte": raw["wte"],            # fp32 for the embedding gather
        "wpe": raw["wpe"],
        "ln_f_g": raw["ln_f_g"], "ln_f_b": raw["ln_f_b"],
        "wte_T": wte_T,               # tied LM head, (H, Vp) bf16
        "layers": [],
    }
    for lp in raw["layers"]:
        w_qkv, b_qkv = lp["w_qkv"], lp["b_qkv"]
        out["layers"].append({
            "ln1_g": lp["ln1_g"], "ln1_b": lp["ln1_b"],
            # softmax 1/sqrt(hd) folded into the query projection (free at prep)
            "w_q": (w_qkv[:, :H] * scale).astype(jnp.bfloat16),
            "b_q": b_qkv[:, :H] * scale,
            "w_k": w_qkv[:, H:2 * H].astype(jnp.bfloat16),
            "b_k": b_qkv[:, H:2 * H],
            "w_v": w_qkv[:, 2 * H:].astype(jnp.bfloat16),
            "b_v": b_qkv[:, 2 * H:],
            # output projection reshaped per head: head merge happens inside the
            # batched matmul in the attention kernel (no in-kernel transpose).
            "w_o_h": lp["w_o"].reshape(num_heads, hd, H).astype(jnp.bfloat16),
            "b_o": lp["b_o"],
            "ln2_g": lp["ln2_g"], "ln2_b": lp["ln2_b"],
            "w_fc": lp["w_fc"].astype(jnp.bfloat16), "b_fc": lp["b_fc"],
            "w_proj": lp["w_proj"].astype(jnp.bfloat16), "b_proj": lp["b_proj"],
        })
    return out


# ------------------------------------ main -----------------------------------

if __name__ == "__main__":
    # Small, forward-consistent shapes (hidden_size, n_layer, n_head, n_ctx, vocab)
    B, S = 2, 16
    HIDDEN, N_LAYER, N_HEAD, VOCAB, MAX_SEQ = 64, 2, 4, 128, 32

    key = jax.random.PRNGKey(0)
    kp, kid = jax.random.split(key)
    raw_params = init_params(kp, VOCAB, MAX_SEQ, HIDDEN, N_LAYER)
    params = prepare_params(raw_params, N_HEAD)

    input_ids = jax.random.randint(kid, (B, S), 0, VOCAB, dtype=jnp.int32)
    attention_mask = jnp.ones((B, S), dtype=jnp.int32).at[1, -3:].set(0)

    fwd = jax.jit(functools.partial(gpt_lm_forward, num_heads=N_HEAD))
    logits = fwd(input_ids, attention_mask, params)
    logits = jax.block_until_ready(logits)

    assert logits.shape == (B, S, VOCAB), logits.shape
    assert bool(jnp.all(jnp.isfinite(logits.astype(jnp.float32))))
    print("KERNEL_OK")
</pallas_src>

<mosaic_0001>
module attributes {stable_mosaic.version = 11 : i64} {
  func.func @_ln_qkv_kernel(%arg0: i32, %arg1: i32, %arg2: memref<1x16x64xbf16, #tpu.memory_space<vmem>>, %arg3: memref<1x64xf32, #tpu.memory_space<vmem>>, %arg4: memref<1x64xf32, #tpu.memory_space<vmem>>, %arg5: memref<64x64xbf16, #tpu.memory_space<vmem>>, %arg6: memref<1x64xf32, #tpu.memory_space<vmem>>, %arg7: memref<64x64xbf16, #tpu.memory_space<vmem>>, %arg8: memref<1x64xf32, #tpu.memory_space<vmem>>, %arg9: memref<64x64xbf16, #tpu.memory_space<vmem>>, %arg10: memref<1x64xf32, #tpu.memory_space<vmem>>, %arg11: memref<1x16x64xbf16, #tpu.memory_space<vmem>>, %arg12: memref<1x16x64xbf16, #tpu.memory_space<vmem>>, %arg13: memref<1x16x64xbf16, #tpu.memory_space<vmem>>) attributes {dimension_semantics = [#tpu.dimension_semantics<parallel>, #tpu.dimension_semantics<parallel>], iteration_bounds = array<i64: 2, 1>, scalar_prefetch = 0 : i64, scratch_operands = 0 : i64, tpu.core_type = #tpu.core_type<tc>, window_params = [{transform_indices = @transform_0, window_bounds = array<i64: 1, 16, 64>}, {pipeline_mode = #tpu.pipeline_mode<synchronous>, transform_indices = @transform_1, window_bounds = array<i64: 1, 64>}, {pipeline_mode = #tpu.pipeline_mode<synchronous>, transform_indices = @transform_2, window_bounds = array<i64: 1, 64>}, {pipeline_mode = #tpu.pipeline_mode<synchronous>, transform_indices = @transform_3, window_bounds = array<i64: 64, 64>}, {pipeline_mode = #tpu.pipeline_mode<synchronous>, transform_indices = @transform_4, window_bounds = array<i64: 1, 64>}, {pipeline_mode = #tpu.pipeline_mode<synchronous>, transform_indices = @transform_5, window_bounds = array<i64: 64, 64>}, {pipeline_mode = #tpu.pipeline_mode<synchronous>, transform_indices = @transform_6, window_bounds = array<i64: 1, 64>}, {pipeline_mode = #tpu.pipeline_mode<synchronous>, transform_indices = @transform_7, window_bounds = array<i64: 64, 64>}, {pipeline_mode = #tpu.pipeline_mode<synchronous>, transform_indices = @transform_8, window_bounds = array<i64: 1, 64>}, {transform_indices = @transform_9, window_bounds = array<i64: 1, 16, 64>}, {transform_indices = @transform_10, window_bounds = array<i64: 1, 16, 64>}, {transform_indices = @transform_11, window_bounds = array<i64: 1, 16, 64>}]} {
    %c0 = arith.constant 0 : index
    %c0_0 = arith.constant 0 : index
    %c0_1 = arith.constant 0 : index
    %0 = vector.load %arg2[%c0, %c0_0, %c0_1] : memref<1x16x64xbf16, #tpu.memory_space<vmem>>, vector<1x16x64xbf16>
    %1 = vector.shape_cast %0 : vector<1x16x64xbf16> to vector<16x64xbf16>
    %2 = arith.extf %1 : vector<16x64xbf16> to vector<16x64xf32>
    %c0_2 = arith.constant 0 : index
    %c0_3 = arith.constant 0 : index
    %3 = vector.load %arg3[%c0_2, %c0_3] : memref<1x64xf32, #tpu.memory_space<vmem>>, vector<1x64xf32>
    %c0_4 = arith.constant 0 : index
    %c0_5 = arith.constant 0 : index
    %4 = vector.load %arg4[%c0_4, %c0_5] : memref<1x64xf32, #tpu.memory_space<vmem>>, vector<1x64xf32>
    %cst = arith.constant dense<0.000000e+00> : vector<16xf32>
    %5 = vector.multi_reduction <add>, %2, %cst [1] : vector<16x64xf32> to vector<16xf32>
    %6 = vector.shape_cast %5 : vector<16xf32> to vector<16x1xf32>
    %cst_6 = arith.constant 6.400000e+01 : f32
    %7 = vector.broadcast %cst_6 : f32 to vector<16x1xf32>
    %8 = arith.divf %6, %7 : vector<16x1xf32>
    %9 = vector.broadcast %8 : vector<16x1xf32> to vector<16x64xf32>
    %10 = arith.subf %2, %9 : vector<16x64xf32>
    %11 = arith.mulf %10, %10 : vector<16x64xf32>
    %cst_7 = arith.constant dense<0.000000e+00> : vector<16xf32>
    %12 = vector.multi_reduction <add>, %11, %cst_7 [1] : vector<16x64xf32> to vector<16xf32>
    %13 = vector.shape_cast %12 : vector<16xf32> to vector<16x1xf32>
    %cst_8 = arith.constant 6.400000e+01 : f32
    %14 = vector.broadcast %cst_8 : f32 to vector<16x1xf32>
    %15 = arith.divf %13, %14 : vector<16x1xf32>
    %16 = vector.broadcast %8 : vector<16x1xf32> to vector<16x64xf32>
    %17 = arith.subf %2, %16 : vector<16x64xf32>
    %cst_9 = arith.constant 9.99999974E-6 : f32
    %18 = vector.broadcast %cst_9 : f32 to vector<16x1xf32>
    %19 = arith.addf %15, %18 : vector<16x1xf32>
    %20 = math.rsqrt %19 : vector<16x1xf32>
    %21 = vector.broadcast %20 : vector<16x1xf32> to vector<16x64xf32>
    %22 = arith.mulf %17, %21 : vector<16x64xf32>
    %23 = vector.broadcast %3 : vector<1x64xf32> to vector<16x64xf32>
    %24 = arith.mulf %22, %23 : vector<16x64xf32>
    %25 = vector.broadcast %4 : vector<1x64xf32> to vector<16x64xf32>
    %26 = arith.addf %24, %25 : vector<16x64xf32>
    %27 = arith.truncf %26 : vector<16x64xf32> to vector<16x64xbf16>
    %c0_10 = arith.constant 0 : index
    %c0_11 = arith.constant 0 : index
    %28 = vector.load %arg5[%c0_10, %c0_11] : memref<64x64xbf16, #tpu.memory_space<vmem>>, vector<64x64xbf16>
    %cst_12 = arith.constant dense<0.000000e+00> : vector<16x64xf32>
    %29 = tpu.matmul %27, %28, %cst_12 {dimension_numbers = #tpu.dot_dimension_numbers<[1], [0], [0], [1], [0, 0, 1, 1], [], []>} : vector<16x64xbf16>, vector<64x64xbf16>, vector<16x64xf32> -> vector<16x64xf32>
    %c0_13 = arith.constant 0 : index
    %c0_14 = arith.constant 0 : index
    %30 = vector.load %arg6[%c0_13, %c0_14] : memref<1x64xf32, #tpu.memory_space<vmem>>, vector<1x64xf32>
    %31 = vector.broadcast %30 : vector<1x64xf32> to vector<16x64xf32>
    %32 = arith.addf %29, %31 : vector<16x64xf32>
    %33 = arith.truncf %32 : vector<16x64xf32> to vector<16x64xbf16>
    %c0_15 = arith.constant 0 : index
    %c0_16 = arith.constant 0 : index
    %c0_17 = arith.constant 0 : index
    %34 = vector.load %arg11[%c0_15, %c0_16, %c0_17] : memref<1x16x64xbf16, #tpu.memory_space<vmem>>, vector<1x16x64xbf16>
    %35 = vector.shape_cast %34 : vector<1x16x64xbf16> to vector<16x64xbf16>
    %36 = vector.shape_cast %33 : vector<16x64xbf16> to vector<1x16x64xbf16>
    tpu.vector_store %arg11[%c0_15, %c0_16, %c0_17], %36 {strides = array<i32>} : memref<1x16x64xbf16, #tpu.memory_space<vmem>>, vector<1x16x64xbf16>,
    %c0_18 = arith.constant 0 : index
    %c0_19 = arith.constant 0 : index
    %37 = vector.load %arg7[%c0_18, %c0_19] : memref<64x64xbf16, #tpu.memory_space<vmem>>, vector<64x64xbf16>
    %cst_20 = arith.constant dense<0.000000e+00> : vector<16x64xf32>
    %38 = tpu.matmul %27, %37, %cst_20 {dimension_numbers = #tpu.dot_dimension_numbers<[1], [0], [0], [1], [0, 0, 1, 1], [], []>} : vector<16x64xbf16>, vector<64x64xbf16>, vector<16x64xf32> -> vector<16x64xf32>
    %c0_21 = arith.constant 0 : index
    %c0_22 = arith.constant 0 : index
    %39 = vector.load %arg8[%c0_21, %c0_22] : memref<1x64xf32, #tpu.memory_space<vmem>>, vector<1x64xf32>
    %40 = vector.broadcast %39 : vector<1x64xf32> to vector<16x64xf32>
    %41 = arith.addf %38, %40 : vector<16x64xf32>
    %42 = arith.truncf %41 : vector<16x64xf32> to vector<16x64xbf16>
    %c0_23 = arith.constant 0 : index
    %c0_24 = arith.constant 0 : index
    %c0_25 = arith.constant 0 : index
    %43 = vector.load %arg12[%c0_23, %c0_24, %c0_25] : memref<1x16x64xbf16, #tpu.memory_space<vmem>>, vector<1x16x64xbf16>
    %44 = vector.shape_cast %43 : vector<1x16x64xbf16> to vector<16x64xbf16>
    %45 = vector.shape_cast %42 : vector<16x64xbf16> to vector<1x16x64xbf16>
    tpu.vector_store %arg12[%c0_23, %c0_24, %c0_25], %45 {strides = array<i32>} : memref<1x16x64xbf16, #tpu.memory_space<vmem>>, vector<1x16x64xbf16>,
    %c0_26 = arith.constant 0 : index
    %c0_27 = arith.constant 0 : index
    %46 = vector.load %arg9[%c0_26, %c0_27] : memref<64x64xbf16, #tpu.memory_space<vmem>>, vector<64x64xbf16>
    %cst_28 = arith.constant dense<0.000000e+00> : vector<16x64xf32>
    %47 = tpu.matmul %27, %46, %cst_28 {dimension_numbers = #tpu.dot_dimension_numbers<[1], [0], [0], [1], [0, 0, 1, 1], [], []>} : vector<16x64xbf16>, vector<64x64xbf16>, vector<16x64xf32> -> vector<16x64xf32>
    %c0_29 = arith.constant 0 : index
    %c0_30 = arith.constant 0 : index
    %48 = vector.load %arg10[%c0_29, %c0_30] : memref<1x64xf32, #tpu.memory_space<vmem>>, vector<1x64xf32>
    %49 = vector.broadcast %48 : vector<1x64xf32> to vector<16x64xf32>
    %50 = arith.addf %47, %49 : vector<16x64xf32>
    %51 = arith.truncf %50 : vector<16x64xf32> to vector<16x64xbf16>
    %c0_31 = arith.constant 0 : index
    %c0_32 = arith.constant 0 : index
    %c0_33 = arith.constant 0 : index
    %52 = vector.load %arg13[%c0_31, %c0_32, %c0_33] : memref<1x16x64xbf16, #tpu.memory_space<vmem>>, vector<1x16x64xbf16>
    %53 = vector.shape_cast %52 : vector<1x16x64xbf16> to vector<16x64xbf16>
    %54 = vector.shape_cast %51 : vector<16x64xbf16> to vector<1x16x64xbf16>
    tpu.vector_store %arg13[%c0_31, %c0_32, %c0_33], %54 {strides = array<i32>} : memref<1x16x64xbf16, #tpu.memory_space<vmem>>, vector<1x16x64xbf16>,
    return
  }
  func.func @transform_0(%arg0: i32, %arg1: i32) -> (i32, i32, i32) {
    %c0_i32 = arith.constant 0 : i32
    %c0_i32_0 = arith.constant 0 : i32
    return %arg0, %arg1, %c0_i32 : i32, i32, i32
  }
  func.func @transform_1(%arg0: i32, %arg1: i32) -> (i32, i32) {
    %c0_i32 = arith.constant 0 : i32
    %c0_i32_0 = arith.constant 0 : i32
    %c0_i32_1 = arith.constant 0 : i32
    return %c0_i32, %c0_i32_0 : i32, i32
  }
  func.func @transform_2(%arg0: i32, %arg1: i32) -> (i32, i32) {
    %c0_i32 = arith.constant 0 : i32
    %c0_i32_0 = arith.constant 0 : i32
    %c0_i32_1 = arith.constant 0 : i32
    return %c0_i32, %c0_i32_0 : i32, i32
  }
  func.func @transform_3(%arg0: i32, %arg1: i32) -> (i32, i32) {
    %c0_i32 = arith.constant 0 : i32
    %c0_i32_0 = arith.constant 0 : i32
    %c0_i32_1 = arith.constant 0 : i32
    return %c0_i32, %c0_i32_0 : i32, i32
  }
  func.func @transform_4(%arg0: i32, %arg1: i32) -> (i32, i32) {
    %c0_i32 = arith.constant 0 : i32
    %c0_i32_0 = arith.constant 0 : i32
    %c0_i32_1 = arith.constant 0 : i32
    return %c0_i32, %c0_i32_0 : i32, i32
  }
  func.func @transform_5(%arg0: i32, %arg1: i32) -> (i32, i32) {
    %c0_i32 = arith.constant 0 : i32
    %c0_i32_0 = arith.constant 0 : i32
    %c0_i32_1 = arith.constant 0 : i32
    return %c0_i32, %c0_i32_0 : i32, i32
  }
  func.func @transform_6(%arg0: i32, %arg1: i32) -> (i32, i32) {
    %c0_i32 = arith.constant 0 : i32
    %c0_i32_0 = arith.constant 0 : i32
    %c0_i32_1 = arith.constant 0 : i32
    return %c0_i32, %c0_i32_0 : i32, i32
  }
  func.func @transform_7(%arg0: i32, %arg1: i32) -> (i32, i32) {
    %c0_i32 = arith.constant 0 : i32
    %c0_i32_0 = arith.constant 0 : i32
    %c0_i32_1 = arith.constant 0 : i32
    return %c0_i32, %c0_i32_0 : i32, i32
  }
  func.func @transform_8(%arg0: i32, %arg1: i32) -> (i32, i32) {
    %c0_i32 = arith.constant 0 : i32
    %c0_i32_0 = arith.constant 0 : i32
    %c0_i32_1 = arith.constant 0 : i32
    return %c0_i32, %c0_i32_0 : i32, i32
  }
  func.func @transform_9(%arg0: i32, %arg1: i32) -> (i32, i32, i32) {
    %c0_i32 = arith.constant 0 : i32
    %c0_i32_0 = arith.constant 0 : i32
    return %arg0, %arg1, %c0_i32 : i32, i32, i32
  }
  func.func @transform_10(%arg0: i32, %arg1: i32) -> (i32, i32, i32) {
    %c0_i32 = arith.constant 0 : i32
    %c0_i32_0 = arith.constant 0 : i32
    return %arg0, %arg1, %c0_i32 : i32, i32, i32
  }
  func.func @transform_11(%arg0: i32, %arg1: i32) -> (i32, i32, i32) {
    %c0_i32 = arith.constant 0 : i32
    %c0_i32_0 = arith.constant 0 : i32
    return %arg0, %arg1, %c0_i32 : i32, i32, i32
  }
}

module attributes {stable_mosaic.version = 11 : i64} {
  func.func @_attn_kernel(%arg0: i32, %arg1: i32, %arg2: memref<1x16x64xbf16, #tpu.memory_space<vmem>>, %arg3: memref<1x4x16x16xbf16, #tpu.memory_space<vmem>>, %arg4: memref<1x4x16x16xbf16, #tpu.memory_space<vmem>>, %arg5: memref<1x4x16x16xbf16, #tpu.memory_space<vmem>>, %arg6: memref<1x1x16xf32, #tpu.memory_space<vmem>>, %arg7: memref<4x16x64xbf16, #tpu.memory_space<vmem>>, %arg8: memref<1x64xf32, #tpu.memory_space<vmem>>, %arg9: memref<1x16x64xbf16, #tpu.memory_space<vmem>>) attributes {dimension_semantics = [#tpu.dimension_semantics<parallel>, #tpu.dimension_semantics<parallel>], iteration_bounds = array<i64: 2, 1>, scalar_prefetch = 0 : i64, scratch_operands = 0 : i64, tpu.core_type = #tpu.core_type<tc>, window_params = [{transform_indices = @transform_0, window_bounds = array<i64: 1, 16, 64>}, {transform_indices = @transform_1, window_bounds = array<i64: 1, 4, 16, 16>}, {transform_indices = @transform_2, window_bounds = array<i64: 1, 4, 16, 16>}, {transform_indices = @transform_3, window_bounds = array<i64: 1, 4, 16, 16>}, {transform_indices = @transform_4, window_bounds = array<i64: 1, 1, 16>}, {pipeline_mode = #tpu.pipeline_mode<synchronous>, transform_indices = @transform_5, window_bounds = array<i64: 4, 16, 64>}, {pipeline_mode = #tpu.pipeline_mode<synchronous>, transform_indices = @transform_6, window_bounds = array<i64: 1, 64>}, {transform_indices = @transform_7, window_bounds = array<i64: 1, 16, 64>}]} {
    %c0 = arith.constant 0 : index
    %c0_0 = arith.constant 0 : index
    %c0_1 = arith.constant 0 : index
    %c0_2 = arith.constant 0 : index
    %0 = vector.load %arg3[%c0, %c0_0, %c0_1, %c0_2] : memref<1x4x16x16xbf16, #tpu.memory_space<vmem>>, vector<1x4x16x16xbf16>
    %1 = vector.shape_cast %0 : vector<1x4x16x16xbf16> to vector<4x16x16xbf16>
    %c0_3 = arith.constant 0 : index
    %c0_4 = arith.constant 0 : index
    %c0_5 = arith.constant 0 : index
    %c0_6 = arith.constant 0 : index
    %2 = vector.load %arg4[%c0_3, %c0_4, %c0_5, %c0_6] : memref<1x4x16x16xbf16, #tpu.memory_space<vmem>>, vector<1x4x16x16xbf16>
    %3 = vector.shape_cast %2 : vector<1x4x16x16xbf16> to vector<4x16x16xbf16>
    %c0_7 = arith.constant 0 : index
    %c0_8 = arith.constant 0 : index
    %c0_9 = arith.constant 0 : index
    %c0_10 = arith.constant 0 : index
    %4 = vector.load %arg5[%c0_7, %c0_8, %c0_9, %c0_10] : memref<1x4x16x16xbf16, #tpu.memory_space<vmem>>, vector<1x4x16x16xbf16>
    %5 = vector.shape_cast %4 : vector<1x4x16x16xbf16> to vector<4x16x16xbf16>
    "tpu.trace_start"() <{level = 10 : i32, message = "hqd,hkd->hqk"}> : () -> ()
    %cst = arith.constant dense<0.000000e+00> : vector<4x16x16xf32>
    %6 = tpu.matmul %1, %3, %cst {dimension_numbers = #tpu.dot_dimension_numbers<[2], [2], [1], [1], [0, 0, 0, 1, 1, 1], [0], [0]>} : vector<4x16x16xbf16>, vector<4x16x16xbf16>, vector<4x16x16xf32> -> vector<4x16x16xf32>
    "tpu.trace_stop"() : () -> ()
    %c16_i32 = arith.constant 16 : i32
    %7 = arith.muli %arg1, %c16_i32 : i32
    %8 = tpu.iota {dimensions = array<i32: 0>} : vector<16x16xi32>
    %9 = vector.broadcast %7 : i32 to vector<16x16xi32>
    %10 = arith.addi %9, %8 : vector<16x16xi32>
    %11 = tpu.iota {dimensions = array<i32: 1>} : vector<16x16xi32>
    %c0_11 = arith.constant 0 : index
    %c0_12 = arith.constant 0 : index
    %c0_13 = arith.constant 0 : index
    %12 = vector.load %arg6[%c0_11, %c0_12, %c0_13] : memref<1x1x16xf32, #tpu.memory_space<vmem>>, vector<1x1x16xf32>
    %13 = vector.shape_cast %12 : vector<1x1x16xf32> to vector<1x16xf32>
    %cst_14 = arith.constant 5.000000e-01 : f32
    %14 = vector.broadcast %cst_14 : f32 to vector<1x16xf32>
    %15 = arith.cmpf ogt, %13, %14 : vector<1x16xf32>
    %16 = arith.cmpi sge, %10, %11 : vector<16x16xi32>
    %17 = vector.broadcast %15 : vector<1x16xi1> to vector<16x16xi1>
    %18 = arith.andi %16, %17 : vector<16x16xi1>
    %19 = vector.shape_cast %18 : vector<16x16xi1> to vector<1x16x16xi1>
    %cst_15 = arith.constant -1.000000e+30 : f32
    %20 = vector.shape_cast %19 : vector<1x16x16xi1> to vector<1x16x16xi1>
    %21 = vector.broadcast %20 : vector<1x16x16xi1> to vector<4x16x16xi1>
    %22 = vector.broadcast %cst_15 : f32 to vector<4x16x16xf32>
    %23 = arith.select %21, %6, %22 : vector<4x16x16xi1>, vector<4x16x16xf32>
    %cst_16 = arith.constant dense<0xFF800000> : vector<4x16xf32>
    %24 = vector.multi_reduction <maximumf>, %23, %cst_16 [2] : vector<4x16x16xf32> to vector<4x16xf32>
    %25 = vector.shape_cast %24 : vector<4x16xf32> to vector<4x16x1xf32>
    %26 = vector.broadcast %25 : vector<4x16x1xf32> to vector<4x16x16xf32>
    %27 = arith.subf %23, %26 : vector<4x16x16xf32>
    %28 = math.exp %27 : vector<4x16x16xf32>
    %cst_17 = arith.constant dense<0.000000e+00> : vector<4x16xf32>
    %29 = vector.multi_reduction <add>, %28, %cst_17 [2] : vector<4x16x16xf32> to vector<4x16xf32>
    %30 = vector.shape_cast %29 : vector<4x16xf32> to vector<4x16x1xf32>
    %31 = arith.truncf %28 : vector<4x16x16xf32> to vector<4x16x16xbf16>
    %32 = tpu.reciprocal %30 {approx = true} : vector<4x16x1xf32> -> vector<4x16x1xf32>
    "tpu.trace_start"() <{level = 10 : i32, message = "hqk,hkd->hqd"}> : () -> ()
    %cst_18 = arith.constant dense<0.000000e+00> : vector<4x16x16xf32>
    %33 = tpu.matmul %31, %5, %cst_18 {dimension_numbers = #tpu.dot_dimension_numbers<[2], [1], [1], [2], [0, 0, 0, 1, 1, 2], [0], [0]>} : vector<4x16x16xbf16>, vector<4x16x16xbf16>, vector<4x16x16xf32> -> vector<4x16x16xf32>
    "tpu.trace_stop"() : () -> ()
    %34 = vector.broadcast %32 : vector<4x16x1xf32> to vector<4x16x16xf32>
    %35 = arith.mulf %33, %34 : vector<4x16x16xf32>
    %36 = arith.truncf %35 : vector<4x16x16xf32> to vector<4x16x16xbf16>
    %c0_19 = arith.constant 0 : index
    %c0_20 = arith.constant 0 : index
    %c0_21 = arith.constant 0 : index
    %37 = vector.load %arg7[%c0_19, %c0_20, %c0_21] : memref<4x16x64xbf16, #tpu.memory_space<vmem>>, vector<4x16x64xbf16>
    "tpu.trace_start"() <{level = 10 : i32, message = "hqd,hdo->hqo"}> : () -> ()
    %cst_22 = arith.constant dense<0.000000e+00> : vector<4x16x64xf32>
    %38 = tpu.matmul %36, %37, %cst_22 {dimension_numbers = #tpu.dot_dimension_numbers<[2], [1], [1], [2], [0, 0, 0, 1, 1, 2], [0], [0]>} : vector<4x16x16xbf16>, vector<4x16x64xbf16>, vector<4x16x64xf32> -> vector<4x16x64xf32>
    "tpu.trace_stop"() : () -> ()
    %cst_23 = arith.constant dense<0.000000e+00> : vector<16x64xf32>
    %39 = vector.multi_reduction <add>, %38, %cst_23 [0] : vector<4x16x64xf32> to vector<16x64xf32>
    %c0_24 = arith.constant 0 : index
    %c0_25 = arith.constant 0 : index
    %40 = vector.load %arg8[%c0_24, %c0_25] : memref<1x64xf32, #tpu.memory_space<vmem>>, vector<1x64xf32>
    %41 = vector.broadcast %40 : vector<1x64xf32> to vector<16x64xf32>
    %42 = arith.addf %39, %41 : vector<16x64xf32>
    %c0_26 = arith.constant 0 : index
    %c0_27 = arith.constant 0 : index
    %c0_28 = arith.constant 0 : index
    %43 = vector.load %arg2[%c0_26, %c0_27, %c0_28] : memref<1x16x64xbf16, #tpu.memory_space<vmem>>, vector<1x16x64xbf16>
    %44 = vector.shape_cast %43 : vector<1x16x64xbf16> to vector<16x64xbf16>
    %45 = arith.extf %44 : vector<16x64xbf16> to vector<16x64xf32>
    %46 = arith.addf %45, %42 : vector<16x64xf32>
    %47 = arith.truncf %46 : vector<16x64xf32> to vector<16x64xbf16>
    %c0_29 = arith.constant 0 : index
    %c0_30 = arith.constant 0 : index
    %c0_31 = arith.constant 0 : index
    %48 = vector.load %arg9[%c0_29, %c0_30, %c0_31] : memref<1x16x64xbf16, #tpu.memory_space<vmem>>, vector<1x16x64xbf16>
    %49 = vector.shape_cast %48 : vector<1x16x64xbf16> to vector<16x64xbf16>
    %50 = vector.shape_cast %47 : vector<16x64xbf16> to vector<1x16x64xbf16>
    tpu.vector_store %arg9[%c0_29, %c0_30, %c0_31], %50 {strides = array<i32>} : memref<1x16x64xbf16, #tpu.memory_space<vmem>>, vector<1x16x64xbf16>,
    return
  }
  func.func @transform_0(%arg0: i32, %arg1: i32) -> (i32, i32, i32) {
    %c0_i32 = arith.constant 0 : i32
    %c0_i32_0 = arith.constant 0 : i32
    return %arg0, %arg1, %c0_i32 : i32, i32, i32
  }
  func.func @transform_1(%arg0: i32, %arg1: i32) -> (i32, i32, i32, i32) {
    %c0_i32 = arith.constant 0 : i32
    %c0_i32_0 = arith.constant 0 : i32
    %c0_i32_1 = arith.constant 0 : i32
    return %arg0, %c0_i32, %arg1, %c0_i32_0 : i32, i32, i32, i32
  }
  func.func @transform_2(%arg0: i32, %arg1: i32) -> (i32, i32, i32, i32) {
    %c0_i32 = arith.constant 0 : i32
    %c0_i32_0 = arith.constant 0 : i32
    %c0_i32_1 = arith.constant 0 : i32
    %c0_i32_2 = arith.constant 0 : i32
    return %arg0, %c0_i32, %c0_i32_0, %c0_i32_1 : i32, i32, i32, i32
  }
  func.func @transform_3(%arg0: i32, %arg1: i32) -> (i32, i32, i32, i32) {
    %c0_i32 = arith.constant 0 : i32
    %c0_i32_0 = arith.constant 0 : i32
    %c0_i32_1 = arith.constant 0 : i32
    %c0_i32_2 = arith.constant 0 : i32
    return %arg0, %c0_i32, %c0_i32_0, %c0_i32_1 : i32, i32, i32, i32
  }
  func.func @transform_4(%arg0: i32, %arg1: i32) -> (i32, i32, i32) {
    %c0_i32 = arith.constant 0 : i32
    %c0_i32_0 = arith.constant 0 : i32
    %c0_i32_1 = arith.constant 0 : i32
    return %arg0, %c0_i32, %c0_i32_0 : i32, i32, i32
  }
  func.func @transform_5(%arg0: i32, %arg1: i32) -> (i32, i32, i32) {
    %c0_i32 = arith.constant 0 : i32
    %c0_i32_0 = arith.constant 0 : i32
    %c0_i32_1 = arith.constant 0 : i32
    %c0_i32_2 = arith.constant 0 : i32
    return %c0_i32, %c0_i32_0, %c0_i32_1 : i32, i32, i32
  }
  func.func @transform_6(%arg0: i32, %arg1: i32) -> (i32, i32) {
    %c0_i32 = arith.constant 0 : i32
    %c0_i32_0 = arith.constant 0 : i32
    %c0_i32_1 = arith.constant 0 : i32
    return %c0_i32, %c0_i32_0 : i32, i32
  }
  func.func @transform_7(%arg0: i32, %arg1: i32) -> (i32, i32, i32) {
    %c0_i32 = arith.constant 0 : i32
    %c0_i32_0 = arith.constant 0 : i32
    return %arg0, %arg1, %c0_i32 : i32, i32, i32
  }
}

module attributes {stable_mosaic.version = 11 : i64} {
  func.func @_mlp_kernel(%arg0: i32, %arg1: i32, %arg2: i32, %arg3: memref<1x16x64xbf16, #tpu.memory_space<vmem>>, %arg4: memref<1x64xf32, #tpu.memory_space<vmem>>, %arg5: memref<1x64xf32, #tpu.memory_space<vmem>>, %arg6: memref<64x256xbf16, #tpu.memory_space<vmem>>, %arg7: memref<1x256xf32, #tpu.memory_space<vmem>>, %arg8: memref<256x64xbf16, #tpu.memory_space<vmem>>, %arg9: memref<1x64xf32, #tpu.memory_space<vmem>>, %arg10: memref<1x16x64xbf16, #tpu.memory_space<vmem>>, %arg11: memref<16x64xbf16, #tpu.memory_space<vmem>>, %arg12: memref<16x64xf32, #tpu.memory_space<vmem>>) attributes {dimension_semantics = [#tpu.dimension_semantics<parallel>, #tpu.dimension_semantics<parallel>, #tpu.dimension_semantics<arbitrary>], iteration_bounds = array<i64: 2, 1, 1>, scalar_prefetch = 0 : i64, scratch_operands = 2 : i64, tpu.core_type = #tpu.core_type<tc>, window_params = [{transform_indices = @transform_0, window_bounds = array<i64: 1, 16, 64>}, {pipeline_mode = #tpu.pipeline_mode<synchronous>, transform_indices = @transform_1, window_bounds = array<i64: 1, 64>}, {pipeline_mode = #tpu.pipeline_mode<synchronous>, transform_indices = @transform_2, window_bounds = array<i64: 1, 64>}, {transform_indices = @transform_3, window_bounds = array<i64: 64, 256>}, {transform_indices = @transform_4, window_bounds = array<i64: 1, 256>}, {transform_indices = @transform_5, window_bounds = array<i64: 256, 64>}, {pipeline_mode = #tpu.pipeline_mode<synchronous>, transform_indices = @transform_6, window_bounds = array<i64: 1, 64>}, {transform_indices = @transform_7, window_bounds = array<i64: 1, 16, 64>}]} {
    %c0_i32 = arith.constant 0 : i32
    %0 = arith.cmpi eq, %arg2, %c0_i32 : i32
    %1 = arith.extui %0 : i1 to i32
    %c0_i32_0 = arith.constant 0 : i32
    %2 = arith.cmpi ne, %1, %c0_i32_0 : i32
    scf.if %2 {
      %c0_19 = arith.constant 0 : index
      %c0_20 = arith.constant 0 : index
      %c0_21 = arith.constant 0 : index
      %31 = vector.load %arg3[%c0_19, %c0_20, %c0_21] : memref<1x16x64xbf16, #tpu.memory_space<vmem>>, vector<1x16x64xbf16>
      %32 = vector.shape_cast %31 : vector<1x16x64xbf16> to vector<16x64xbf16>
      %33 = arith.extf %32 : vector<16x64xbf16> to vector<16x64xf32>
      %c0_22 = arith.constant 0 : index
      %c0_23 = arith.constant 0 : index
      %34 = vector.load %arg4[%c0_22, %c0_23] : memref<1x64xf32, #tpu.memory_space<vmem>>, vector<1x64xf32>
      %c0_24 = arith.constant 0 : index
      %c0_25 = arith.constant 0 : index
      %35 = vector.load %arg5[%c0_24, %c0_25] : memref<1x64xf32, #tpu.memory_space<vmem>>, vector<1x64xf32>
      %cst_26 = arith.constant dense<0.000000e+00> : vector<16xf32>
      %36 = vector.multi_reduction <add>, %33, %cst_26 [1] : vector<16x64xf32> to vector<16xf32>
      %37 = vector.shape_cast %36 : vector<16xf32> to vector<16x1xf32>
      %cst_27 = arith.constant 6.400000e+01 : f32
      %38 = vector.broadcast %cst_27 : f32 to vector<16x1xf32>
      %39 = arith.divf %37, %38 : vector<16x1xf32>
      %40 = vector.broadcast %39 : vector<16x1xf32> to vector<16x64xf32>
      %41 = arith.subf %33, %40 : vector<16x64xf32>
      %42 = arith.mulf %41, %41 : vector<16x64xf32>
      %cst_28 = arith.constant dense<0.000000e+00> : vector<16xf32>
      %43 = vector.multi_reduction <add>, %42, %cst_28 [1] : vector<16x64xf32> to vector<16xf32>
      %44 = vector.shape_cast %43 : vector<16xf32> to vector<16x1xf32>
      %cst_29 = arith.constant 6.400000e+01 : f32
      %45 = vector.broadcast %cst_29 : f32 to vector<16x1xf32>
      %46 = arith.divf %44, %45 : vector<16x1xf32>
      %47 = vector.broadcast %39 : vector<16x1xf32> to vector<16x64xf32>
      %48 = arith.subf %33, %47 : vector<16x64xf32>
      %cst_30 = arith.constant 9.99999974E-6 : f32
      %49 = vector.broadcast %cst_30 : f32 to vector<16x1xf32>
      %50 = arith.addf %46, %49 : vector<16x1xf32>
      %51 = math.rsqrt %50 : vector<16x1xf32>
      %52 = vector.broadcast %51 : vector<16x1xf32> to vector<16x64xf32>
      %53 = arith.mulf %48, %52 : vector<16x64xf32>
      %54 = vector.broadcast %34 : vector<1x64xf32> to vector<16x64xf32>
      %55 = arith.mulf %53, %54 : vector<16x64xf32>
      %56 = vector.broadcast %35 : vector<1x64xf32> to vector<16x64xf32>
      %57 = arith.addf %55, %56 : vector<16x64xf32>
      %58 = arith.truncf %57 : vector<16x64xf32> to vector<16x64xbf16>
      %c0_31 = arith.constant 0 : index
      %c0_32 = arith.constant 0 : index
      %59 = vector.load %arg11[%c0_31, %c0_32] : memref<16x64xbf16, #tpu.memory_space<vmem>>, vector<16x64xbf16>
      tpu.vector_store %arg11[%c0_31, %c0_32], %58 {strides = array<i32>} : memref<16x64xbf16, #tpu.memory_space<vmem>>, vector<16x64xbf16>,
      %cst_33 = arith.constant 0.000000e+00 : f32
      %60 = vector.broadcast %cst_33 : f32 to vector<16x64xf32>
      %c0_34 = arith.constant 0 : index
      %c0_35 = arith.constant 0 : index
      %61 = vector.load %arg12[%c0_34, %c0_35] : memref<16x64xf32, #tpu.memory_space<vmem>>, vector<16x64xf32>
      tpu.vector_store %arg12[%c0_34, %c0_35], %60 {strides = array<i32>} : memref<16x64xf32, #tpu.memory_space<vmem>>, vector<16x64xf32>,
    } else {
    }
    %c0 = arith.constant 0 : index
    %c0_1 = arith.constant 0 : index
    %3 = vector.load %arg11[%c0, %c0_1] : memref<16x64xbf16, #tpu.memory_space<vmem>>, vector<16x64xbf16>
    %c0_2 = arith.constant 0 : index
    %c0_3 = arith.constant 0 : index
    %4 = vector.load %arg6[%c0_2, %c0_3] : memref<64x256xbf16, #tpu.memory_space<vmem>>, vector<64x256xbf16>
    %cst = arith.constant dense<0.000000e+00> : vector<16x256xf32>
    %5 = tpu.matmul %3, %4, %cst {dimension_numbers = #tpu.dot_dimension_numbers<[1], [0], [0], [1], [0, 0, 1, 1], [], []>} : vector<16x64xbf16>, vector<64x256xbf16>, vector<16x256xf32> -> vector<16x256xf32>
    %c0_4 = arith.constant 0 : index
    %c0_5 = arith.constant 0 : index
    %6 = vector.load %arg7[%c0_4, %c0_5] : memref<1x256xf32, #tpu.memory_space<vmem>>, vector<1x256xf32>
    %7 = vector.broadcast %6 : vector<1x256xf32> to vector<16x256xf32>
    %8 = arith.addf %5, %7 : vector<16x256xf32>
    %cst_6 = arith.constant 5.000000e-01 : f32
    %9 = vector.broadcast %cst_6 : f32 to vector<16x256xf32>
    %10 = arith.mulf %9, %8 : vector<16x256xf32>
    %cst_7 = arith.constant 4.471500e-02 : f32
    %11 = vector.broadcast %cst_7 : f32 to vector<16x256xf32>
    %12 = arith.mulf %11, %8 : vector<16x256xf32>
    %13 = arith.mulf %12, %8 : vector<16x256xf32>
    %14 = arith.mulf %13, %8 : vector<16x256xf32>
    %15 = arith.addf %8, %14 : vector<16x256xf32>
    %cst_8 = arith.constant 0.797884583 : f32
    %16 = vector.broadcast %cst_8 : f32 to vector<16x256xf32>
    %17 = arith.mulf %16, %15 : vector<16x256xf32>
    %18 = math.tanh %17 : vector<16x256xf32>
    %cst_9 = arith.constant 1.000000e+00 : f32
    %19 = vector.broadcast %cst_9 : f32 to vector<16x256xf32>
    %20 = arith.addf %19, %18 : vector<16x256xf32>
    %21 = arith.mulf %10, %20 : vector<16x256xf32>
    %c0_10 = arith.constant 0 : index
    %c0_11 = arith.constant 0 : index
    %22 = vector.load %arg12[%c0_10, %c0_11] : memref<16x64xf32, #tpu.memory_space<vmem>>, vector<16x64xf32>
    %23 = arith.truncf %21 : vector<16x256xf32> to vector<16x256xbf16>
    %c0_12 = arith.constant 0 : index
    %c0_13 = arith.constant 0 : index
    %24 = vector.load %arg8[%c0_12, %c0_13] : memref<256x64xbf16, #tpu.memory_space<vmem>>, vector<256x64xbf16>
    %cst_14 = arith.constant dense<0.000000e+00> : vector<16x64xf32>
    %25 = tpu.matmul %23, %24, %cst_14 {dimension_numbers = #tpu.dot_dimension_numbers<[1], [0], [0], [1], [0, 0, 1, 1], [], []>} : vector<16x256xbf16>, vector<256x64xbf16>, vector<16x64xf32> -> vector<16x64xf32>
    %26 = arith.addf %22, %25 : vector<16x64xf32>
    %c0_15 = arith.constant 0 : index
    %c0_16 = arith.constant 0 : index
    %27 = vector.load %arg12[%c0_15, %c0_16] : memref<16x64xf32, #tpu.memory_space<vmem>>, vector<16x64xf32>
    tpu.vector_store %arg12[%c0_15, %c0_16], %26 {strides = array<i32>} : memref<16x64xf32, #tpu.memory_space<vmem>>, vector<16x64xf32>,
    %c0_i32_17 = arith.constant 0 : i32
    %28 = arith.cmpi eq, %arg2, %c0_i32_17 : i32
    %29 = arith.extui %28 : i1 to i32
    %c0_i32_18 = arith.constant 0 : i32
    %30 = arith.cmpi ne, %29, %c0_i32_18 : i32
    scf.if %30 {
      %c0_19 = arith.constant 0 : index
      %c0_20 = arith.constant 0 : index
      %c0_21 = arith.constant 0 : index
      %31 = vector.load %arg3[%c0_19, %c0_20, %c0_21] : memref<1x16x64xbf16, #tpu.memory_space<vmem>>, vector<1x16x64xbf16>
      %32 = vector.shape_cast %31 : vector<1x16x64xbf16> to vector<16x64xbf16>
      %33 = arith.extf %32 : vector<16x64xbf16> to vector<16x64xf32>
      %c0_22 = arith.constant 0 : index
      %c0_23 = arith.constant 0 : index
      %34 = vector.load %arg12[%c0_22, %c0_23] : memref<16x64xf32, #tpu.memory_space<vmem>>, vector<16x64xf32>
      %35 = arith.addf %33, %34 : vector<16x64xf32>
      %c0_24 = arith.constant 0 : index
      %c0_25 = arith.constant 0 : index
      %36 = vector.load %arg9[%c0_24, %c0_25] : memref<1x64xf32, #tpu.memory_space<vmem>>, vector<1x64xf32>
      %37 = vector.broadcast %36 : vector<1x64xf32> to vector<16x64xf32>
      %38 = arith.addf %35, %37 : vector<16x64xf32>
      %39 = arith.truncf %38 : vector<16x64xf32> to vector<16x64xbf16>
      %c0_26 = arith.constant 0 : index
      %c0_27 = arith.constant 0 : index
      %c0_28 = arith.constant 0 : index
      %40 = vector.load %arg10[%c0_26, %c0_27, %c0_28] : memref<1x16x64xbf16, #tpu.memory_space<vmem>>, vector<1x16x64xbf16>
      %41 = vector.shape_cast %40 : vector<1x16x64xbf16> to vector<16x64xbf16>
      %42 = vector.shape_cast %39 : vector<16x64xbf16> to vector<1x16x64xbf16>
      tpu.vector_store %arg10[%c0_26, %c0_27, %c0_28], %42 {strides = array<i32>} : memref<1x16x64xbf16, #tpu.memory_space<vmem>>, vector<1x16x64xbf16>,
    } else {
    }
    return
  }
  func.func @transform_0(%arg0: i32, %arg1: i32, %arg2: i32) -> (i32, i32, i32) {
    %c0_i32 = arith.constant 0 : i32
    %c0_i32_0 = arith.constant 0 : i32
    return %arg0, %arg1, %c0_i32 : i32, i32, i32
  }
  func.func @transform_1(%arg0: i32, %arg1: i32, %arg2: i32) -> (i32, i32) {
    %c0_i32 = arith.constant 0 : i32
    %c0_i32_0 = arith.constant 0 : i32
    %c0_i32_1 = arith.constant 0 : i32
    return %c0_i32, %c0_i32_0 : i32, i32
  }
  func.func @transform_2(%arg0: i32, %arg1: i32, %arg2: i32) -> (i32, i32) {
    %c0_i32 = arith.constant 0 : i32
    %c0_i32_0 = arith.constant 0 : i32
    %c0_i32_1 = arith.constant 0 : i32
    return %c0_i32, %c0_i32_0 : i32, i32
  }
  func.func @transform_3(%arg0: i32, %arg1: i32, %arg2: i32) -> (i32, i32) {
    %c0_i32 = arith.constant 0 : i32
    %c0_i32_0 = arith.constant 0 : i32
    return %c0_i32, %arg2 : i32, i32
  }
  func.func @transform_4(%arg0: i32, %arg1: i32, %arg2: i32) -> (i32, i32) {
    %c0_i32 = arith.constant 0 : i32
    %c0_i32_0 = arith.constant 0 : i32
    return %c0_i32, %arg2 : i32, i32
  }
  func.func @transform_5(%arg0: i32, %arg1: i32, %arg2: i32) -> (i32, i32) {
    %c0_i32 = arith.constant 0 : i32
    %c0_i32_0 = arith.constant 0 : i32
    return %arg2, %c0_i32 : i32, i32
  }
  func.func @transform_6(%arg0: i32, %arg1: i32, %arg2: i32) -> (i32, i32) {
    %c0_i32 = arith.constant 0 : i32
    %c0_i32_0 = arith.constant 0 : i32
    %c0_i32_1 = arith.constant 0 : i32
    return %c0_i32, %c0_i32_0 : i32, i32
  }
  func.func @transform_7(%arg0: i32, %arg1: i32, %arg2: i32) -> (i32, i32, i32) {
    %c0_i32 = arith.constant 0 : i32
    %c0_i32_0 = arith.constant 0 : i32
    return %arg0, %arg1, %c0_i32 : i32, i32, i32
  }
}

module attributes {stable_mosaic.version = 11 : i64} {
  func.func @_lnf_kernel(%arg0: i32, %arg1: i32, %arg2: memref<1x16x64xbf16, #tpu.memory_space<vmem>>, %arg3: memref<1x64xf32, #tpu.memory_space<vmem>>, %arg4: memref<1x64xf32, #tpu.memory_space<vmem>>, %arg5: memref<1x16x64xbf16, #tpu.memory_space<vmem>>) attributes {dimension_semantics = [#tpu.dimension_semantics<parallel>, #tpu.dimension_semantics<parallel>], iteration_bounds = array<i64: 2, 1>, scalar_prefetch = 0 : i64, scratch_operands = 0 : i64, tpu.core_type = #tpu.core_type<tc>, window_params = [{transform_indices = @transform_0, window_bounds = array<i64: 1, 16, 64>}, {pipeline_mode = #tpu.pipeline_mode<synchronous>, transform_indices = @transform_1, window_bounds = array<i64: 1, 64>}, {pipeline_mode = #tpu.pipeline_mode<synchronous>, transform_indices = @transform_2, window_bounds = array<i64: 1, 64>}, {transform_indices = @transform_3, window_bounds = array<i64: 1, 16, 64>}]} {
    %c0 = arith.constant 0 : index
    %c0_0 = arith.constant 0 : index
    %c0_1 = arith.constant 0 : index
    %0 = vector.load %arg2[%c0, %c0_0, %c0_1] : memref<1x16x64xbf16, #tpu.memory_space<vmem>>, vector<1x16x64xbf16>
    %1 = vector.shape_cast %0 : vector<1x16x64xbf16> to vector<16x64xbf16>
    %2 = arith.extf %1 : vector<16x64xbf16> to vector<16x64xf32>
    %c0_2 = arith.constant 0 : index
    %c0_3 = arith.constant 0 : index
    %3 = vector.load %arg3[%c0_2, %c0_3] : memref<1x64xf32, #tpu.memory_space<vmem>>, vector<1x64xf32>
    %c0_4 = arith.constant 0 : index
    %c0_5 = arith.constant 0 : index
    %4 = vector.load %arg4[%c0_4, %c0_5] : memref<1x64xf32, #tpu.memory_space<vmem>>, vector<1x64xf32>
    %cst = arith.constant dense<0.000000e+00> : vector<16xf32>
    %5 = vector.multi_reduction <add>, %2, %cst [1] : vector<16x64xf32> to vector<16xf32>
    %6 = vector.shape_cast %5 : vector<16xf32> to vector<16x1xf32>
    %cst_6 = arith.constant 6.400000e+01 : f32
    %7 = vector.broadcast %cst_6 : f32 to vector<16x1xf32>
    %8 = arith.divf %6, %7 : vector<16x1xf32>
    %9 = vector.broadcast %8 : vector<16x1xf32> to vector<16x64xf32>
    %10 = arith.subf %2, %9 : vector<16x64xf32>
    %11 = arith.mulf %10, %10 : vector<16x64xf32>
    %cst_7 = arith.constant dense<0.000000e+00> : vector<16xf32>
    %12 = vector.multi_reduction <add>, %11, %cst_7 [1] : vector<16x64xf32> to vector<16xf32>
    %13 = vector.shape_cast %12 : vector<16xf32> to vector<16x1xf32>
    %cst_8 = arith.constant 6.400000e+01 : f32
    %14 = vector.broadcast %cst_8 : f32 to vector<16x1xf32>
    %15 = arith.divf %13, %14 : vector<16x1xf32>
    %16 = vector.broadcast %8 : vector<16x1xf32> to vector<16x64xf32>
    %17 = arith.subf %2, %16 : vector<16x64xf32>
    %cst_9 = arith.constant 9.99999974E-6 : f32
    %18 = vector.broadcast %cst_9 : f32 to vector<16x1xf32>
    %19 = arith.addf %15, %18 : vector<16x1xf32>
    %20 = math.rsqrt %19 : vector<16x1xf32>
    %21 = vector.broadcast %20 : vector<16x1xf32> to vector<16x64xf32>
    %22 = arith.mulf %17, %21 : vector<16x64xf32>
    %23 = vector.broadcast %3 : vector<1x64xf32> to vector<16x64xf32>
    %24 = arith.mulf %22, %23 : vector<16x64xf32>
    %25 = vector.broadcast %4 : vector<1x64xf32> to vector<16x64xf32>
    %26 = arith.addf %24, %25 : vector<16x64xf32>
    %27 = arith.truncf %26 : vector<16x64xf32> to vector<16x64xbf16>
    %c0_10 = arith.constant 0 : index
    %c0_11 = arith.constant 0 : index
    %c0_12 = arith.constant 0 : index
    %28 = vector.load %arg5[%c0_10, %c0_11, %c0_12] : memref<1x16x64xbf16, #tpu.memory_space<vmem>>, vector<1x16x64xbf16>
    %29 = vector.shape_cast %28 : vector<1x16x64xbf16> to vector<16x64xbf16>
    %30 = vector.shape_cast %27 : vector<16x64xbf16> to vector<1x16x64xbf16>
    tpu.vector_store %arg5[%c0_10, %c0_11, %c0_12], %30 {strides = array<i32>} : memref<1x16x64xbf16, #tpu.memory_space<vmem>>, vector<1x16x64xbf16>,
    return
  }
  func.func @transform_0(%arg0: i32, %arg1: i32) -> (i32, i32, i32) {
    %c0_i32 = arith.constant 0 : i32
    %c0_i32_0 = arith.constant 0 : i32
    return %arg0, %arg1, %c0_i32 : i32, i32, i32
  }
  func.func @transform_1(%arg0: i32, %arg1: i32) -> (i32, i32) {
    %c0_i32 = arith.constant 0 : i32
    %c0_i32_0 = arith.constant 0 : i32
    %c0_i32_1 = arith.constant 0 : i32
    return %c0_i32, %c0_i32_0 : i32, i32
  }
  func.func @transform_2(%arg0: i32, %arg1: i32) -> (i32, i32) {
    %c0_i32 = arith.constant 0 : i32
    %c0_i32_0 = arith.constant 0 : i32
    %c0_i32_1 = arith.constant 0 : i32
    return %c0_i32, %c0_i32_0 : i32, i32
  }
  func.func @transform_3(%arg0: i32, %arg1: i32) -> (i32, i32, i32) {
    %c0_i32 = arith.constant 0 : i32
    %c0_i32_0 = arith.constant 0 : i32
    return %arg0, %arg1, %c0_i32 : i32, i32, i32
  }
}

module attributes {stable_mosaic.version = 11 : i64} {
  func.func @_lm_head_kernel(%arg0: i32, %arg1: i32, %arg2: i32, %arg3: memref<1x16x64xbf16, #tpu.memory_space<vmem>>, %arg4: memref<64x128xbf16, #tpu.memory_space<vmem>>, %arg5: memref<1x16x128xbf16, #tpu.memory_space<vmem>>) attributes {dimension_semantics = [#tpu.dimension_semantics<arbitrary>, #tpu.dimension_semantics<parallel>, #tpu.dimension_semantics<parallel>], iteration_bounds = array<i64: 1, 2, 1>, scalar_prefetch = 0 : i64, scratch_operands = 0 : i64, tpu.core_type = #tpu.core_type<tc>, window_params = [{transform_indices = @transform_0, window_bounds = array<i64: 1, 16, 64>}, {pipeline_mode = #tpu.pipeline_mode<synchronous>, transform_indices = @transform_1, window_bounds = array<i64: 64, 128>}, {transform_indices = @transform_2, window_bounds = array<i64: 1, 16, 128>}]} {
    %c0 = arith.constant 0 : index
    %c0_0 = arith.constant 0 : index
    %c0_1 = arith.constant 0 : index
    %0 = vector.load %arg3[%c0, %c0_0, %c0_1] : memref<1x16x64xbf16, #tpu.memory_space<vmem>>, vector<1x16x64xbf16>
    %1 = vector.shape_cast %0 : vector<1x16x64xbf16> to vector<16x64xbf16>
    %c0_2 = arith.constant 0 : index
    %c0_3 = arith.constant 0 : index
    %2 = vector.load %arg4[%c0_2, %c0_3] : memref<64x128xbf16, #tpu.memory_space<vmem>>, vector<64x128xbf16>
    %cst = arith.constant dense<0.000000e+00> : vector<16x128xf32>
    %3 = tpu.matmul %1, %2, %cst {dimension_numbers = #tpu.dot_dimension_numbers<[1], [0], [0], [1], [0, 0, 1, 1], [], []>} : vector<16x64xbf16>, vector<64x128xbf16>, vector<16x128xf32> -> vector<16x128xf32>
    %4 = arith.truncf %3 : vector<16x128xf32> to vector<16x128xbf16>
    %c0_4 = arith.constant 0 : index
    %c0_5 = arith.constant 0 : index
    %c0_6 = arith.constant 0 : index
    %5 = vector.load %arg5[%c0_4, %c0_5, %c0_6] : memref<1x16x128xbf16, #tpu.memory_space<vmem>>, vector<1x16x128xbf16>
    %6 = vector.shape_cast %5 : vector<1x16x128xbf16> to vector<16x128xbf16>
    %7 = vector.shape_cast %4 : vector<16x128xbf16> to vector<1x16x128xbf16>
    tpu.vector_store %arg5[%c0_4, %c0_5, %c0_6], %7 {strides = array<i32>} : memref<1x16x128xbf16, #tpu.memory_space<vmem>>, vector<1x16x128xbf16>,
    return
  }
  func.func @transform_0(%arg0: i32, %arg1: i32, %arg2: i32) -> (i32, i32, i32) {
    %c0_i32 = arith.constant 0 : i32
    %c0_i32_0 = arith.constant 0 : i32
    return %arg1, %arg2, %c0_i32 : i32, i32, i32
  }
  func.func @transform_1(%arg0: i32, %arg1: i32, %arg2: i32) -> (i32, i32) {
    %c0_i32 = arith.constant 0 : i32
    %c0_i32_0 = arith.constant 0 : i32
    return %c0_i32, %arg0 : i32, i32
  }
  func.func @transform_2(%arg0: i32, %arg1: i32, %arg2: i32) -> (i32, i32, i32) {
    %c0_i32 = arith.constant 0 : i32
    return %arg1, %arg2, %arg0 : i32, i32, i32
  }
}

</mosaic_0001>

<bundles_post_ra>
// kernel: gpt_lm_forward.8
= control target key start
LH: loop header
LB: loop body
LE: loop exit
PB: predicated region body
PF: predicated region fallthrough
CT: control target
= control target key end

     0   :  { %s1220_s17 = smov 0   ;;  %s1222_s18 = smov 0   ;;  %s1332_s0 = inlined_call_operand.vmem [shape: bf16[2,16,64], index: 0, kind: input, shape index: {}]   ;;  %s1333_s1 = inlined_call_operand.vmem [shape: f32[1,64], index: 1, kind: input, shape index: {}]   ;;  %s1334_s2 = inlined_call_operand.vmem [shape: f32[1,64], index: 2, kind: input, shape index: {}]   ;;  %s1335_s3 = inlined_call_operand.vmem [shape: bf16[64,64], index: 3, kind: input, shape index: {}]   ;;  %s1336_s4 = inlined_call_operand.vmem [shape: f32[1,64], index: 4, kind: input, shape index: {}]   ;;  %s1337_s5 = inlined_call_operand.vmem [shape: bf16[64,64], index: 5, kind: input, shape index: {}]   ;;  %s1338_s6 = inlined_call_operand.vmem [shape: f32[1,64], index: 6, kind: input, shape index: {}]   ;;  %s1339_s7 = inlined_call_operand.vmem [shape: bf16[64,64], index: 7, kind: input, shape index: {}]   ;;  %s1340_s8 = inlined_call_operand.vmem [shape: f32[1,64], index: 8, kind: input, shape index: {}]   ;;  %s1341_s9 = inlined_call_operand.vmem [shape: bf16[2,16,64], index: 9, kind: output, shape index: {0}]   ;;  %s1342_s10 = inlined_call_operand.vmem [shape: bf16[2,16,64], index: 10, kind: output, shape index: {1}]   ;;  %s1343_s11 = inlined_call_operand.vmem [shape: bf16[2,16,64], index: 11, kind: output, shape index: {2}]  }
   0x1   :  { %s1224_s19 = smov 0  }
   0x2 LB: > { %s34_s20 = sadd.s32 1, %s1152_s18  ;;  %p990_p0 = scmp.ge.s32.totalorder %s1156_s19, 1  ;;  %s1156_s19 = sphi %s1224_s19, %s22_s19   ;;  %s1152_s18 = sphi %s1222_s18, %s1345_s18   ;;  %s1148_s17 = sphi %s1220_s17, %s1344_s17  }
   0x3   : > { %p36_p1 = scmp.ge.s32.totalorder %s34_s20, 2  ;;  %p367_p2 = scmp.lt.s32.totalorder %s1156_s19, 3 }
   0x5   : > { %s1347_s20 = smov (%p36_p1, %s34_s20), 0  ;;  %p368_p3 = pnand %p990_p0, %p367_p2 }
   0x6   : > { %p434_p4 = scmp.lt.s32.totalorder (!%p368_p3), %s1148_s17, 1 }
   0x7   : > { %371 = sbr.rel (%p368_p3) target bundleno = 550 (0x226), region = 56 }
   0xc   : > { %s1349_s17 = smov (!%p434_p4, %s1148_s17), 1  ;;  %vm480_vm0 = vcmask 523264   ;;  %v1118_v15 = vld [vmem:[%s1335_s3 + $0x18] sm:$0xff]   ;;  %v1158_v17 = vmov 0.0   ;;  %v1120_v18 = vld [vmem:[%s1335_s3 + $0x10] sm:$0xff]   ;;  %vm1159_vm1 = vmmov 0  }
   0xd   : > { %s1238_s21 = sshll.u32 %s1349_s17, 3  ;;  %v1119_v16 = vld [vmem:[%s1337_s5 + $0x18] sm:$0xff]   ;;  %1056 = vmatprep.subr.bf16.mxu0 %v1158_v17  ;;  %1068 = vmatprep.subr.bf16.mxu1 %v1158_v17  ;;  %v1121_v19 = vld [vmem:[%s1337_s5 + $0x10] sm:$0xff]   ;;  %v1122_v20 = vld [vmem:[%s1335_s3 + $0x8] sm:$0xff]   ;;  %vm616_vm2 = vcmask 519168  }
   0xe   : > { %s441_s24 = scalar_lea.vmem %s1332_s0, %s1238_s21  ;;  %1057 = vmatpush3.bf16.msra.mxu0 %v1118_v15  ;;  %1069 = vmatpush3.bf16.msra.mxu1 %v1119_v16  ;;  %v1123_v21 = vld [vmem:[%s1337_s5 + $0x8] sm:$0xff]   ;;  %v1124_v22 = vld [vmem:[%s1335_s3] sm:$0xff]   ;;  %v1126_v40 = vld [vmem:[%s1339_s7 + $0x18] sm:$0xff]   ;;  %s451_s29 = scalar_lea.vmem %s1341_s9, %s1238_s21 }
   0xf   : > { %v1038_v0 = vld [vmem:[%s441_s24] sm:$0xff]   ;;  %1058 = vmatprep.subr.bf16.mxu0 %v1158_v17  ;;  %1070 = vmatprep.subr.bf16.mxu1 %v1158_v17  ;;  %v1127_v42 = vld [vmem:[%s1339_s7 + $0x10] sm:$0xff]   ;;  %v1128_v43 = vld [vmem:[%s1339_s7 + $0x8] sm:$0xff]   ;;  %s461_s13 = scalar_lea.vmem %s1342_s10, %s1238_s21  ;;  %s471_s22 = scalar_lea.vmem %s1343_s11, %s1238_s21 }
  0x10   : > { %v1039_v1 = vunpack.c.l.bf16 %v1038_v0  ;;  %v1040_v2 = vunpack.c.h.bf16 %v1038_v0  ;;  %1064 = vmatprep.mubr.msk.bf16.mxu0 %vm1159_vm1, %v1158_v17  ;;  %1076 = vmatprep.mubr.msk.bf16.mxu1 %vm1159_vm1, %v1158_v17  ;;  %v1125_v23 = vld [vmem:[%s1337_s5] sm:$0xff]  }
  0x11   : > { %v999_v32 = vld [vmem:[%s1333_s1] ss:$0 sm:$0xff] }
  0x12   : > { %v481_v3 = vsel %vm480_vm0, %v1039_v1, 0.0  ;;  %v484_v4 = vsel %vm480_vm0, %v1040_v2, 0.0  ;;  %1059 = vmatpush3.bf16.msra.mxu0 %v1120_v18  ;;  %1071 = vmatpush3.bf16.msra.mxu1 %v1121_v19  ;;  %v1000_v36 = vld [vmem:[%s1334_s2] ss:$0 sm:$0xff] }
  0x13   : > { %482 = vadd.xlane.f32.xlu0 %v481_v3  ;;  %1060 = vmatprep.subr.bf16.mxu0 %v1158_v17  ;;  %v1129_v44 = vld [vmem:[%s1339_s7] sm:$0xff]  }
  0x14   : > { %1072 = vmatprep.subr.bf16.mxu1 %v1158_v17  ;;  %v1001_v45 = vld [vmem:[%s1336_s4] ss:$0 sm:$0xff] }
  0x15   : > { %v1009_v46 = vld [vmem:[%s1338_s6] ss:$0 sm:$0xff] }
  0x16   : > { %1061 = vmatpush3.bf16.msra.mxu0 %v1122_v20  ;;  %1073 = vmatpush3.bf16.msra.mxu1 %v1123_v21  ;;  %v1017_v63 = vld [vmem:[%s1340_s8] ss:$0 sm:$0xff] }
  0x17   : > { %485 = vadd.xlane.f32.xlu0 %v484_v4  ;;  %1062 = vmatprep.subr.bf16.mxu0 %v1158_v17 }
  0x18   : > { %1074 = vmatprep.subr.bf16.mxu1 %v1158_v17 }
  0x1a   : > { %1063 = vmatpush3.bf16.msra.mxu0 %v1124_v22  ;;  %1075 = vmatpush3.bf16.msra.mxu1 %v1125_v23 }
  0x1b   : > { %1080 = vmatprep.subr.bf16.mxu0 %v1158_v17 }
  0x9c   : > { %v483_v5 = vpop.xlane.xlu0 %482 }
  0x9d   : > { %v488_v6 = vmul.f32 0.015625, %v483_v5 }
  0x9f   : > { %v490_v7 = vsub.f32 %v1039_v1, %v488_v6 }
  0xa0   : > { %v486_v8 = vpop.xlane.xlu0 %485 }
  0xa1   : > { %v489_v9 = vmul.f32 0.015625, %v486_v8  ;;  %v492_v10 = vmul.f32 %v490_v7, %v490_v7 }
  0xa3   : > { %v491_v11 = vsub.f32 %v1040_v2, %v489_v9  ;;  %v494_v12 = vsel %vm480_vm0, %v492_v10, 0.0 }
  0xa4   : > { %495 = vadd.xlane.f32.xlu1 %v494_v12 }
  0xa5   : > { %v493_v13 = vmul.f32 %v491_v11, %v491_v11 }
  0xa7   : > { %v497_v14 = vsel %vm480_vm0, %v493_v13, 0.0 }
  0xa8   : > { %498 = vadd.xlane.f32.xlu1 %v497_v14 }
 0x12d   : > { %v496_v24 = vpop.xlane.xlu1 %495 }
 0x12e   : > { %v500_v25 = vmul.f32 0.015625, %v496_v24 }
 0x130   : > { %v502_v26 = vadd.f32 1e-05, %v500_v25 }
 0x131   : > { %v499_v27 = vpop.xlane.xlu1 %498 }
 0x132   : > { %1130 = vrsqrt.f32 %v502_v26  ;;  %v501_v28 = vmul.f32 0.015625, %v499_v27 }
 0x134   : > { %v503_v29 = vadd.f32 1e-05, %v501_v28 }
 0x136   : > { %1132 = vrsqrt.f32 %v503_v29 }
 0x13f   : > { %v1131_v30 = vpop.eup %1130 }
 0x140   : > { %v506_v31 = vmul.f32 %v1131_v30, %v490_v7 }
 0x142   : > { %v514_v35 = vmul.f32 %v999_v32, %v506_v31 }
 0x143   : > { %v1133_v33 = vpop.eup %1132 }
 0x144   : > { %v507_v34 = vmul.f32 %v1133_v33, %v491_v11  ;;  %v522_v38 = vadd.f32 %v1000_v36, %v514_v35 }
 0x146   : > { %v515_v37 = vmul.f32 %v999_v32, %v507_v34 }
 0x148   : > { %v523_v39 = vadd.f32 %v1000_v36, %v515_v37 }
 0x14a   : > { %v524_v41 = vpack.c.bf16 %v523_v39, %v522_v38 }
 0x14c   : > { %1065 = vmatmul.mubr.msk.bf16.vlgmr.msra.gmra.mxu0 %vm480_vm0, %v524_v41  ;;  %1077 = vmatmul.mubr.msk.bf16.vlgmr.msra.gmra.mxu1 %vm480_vm0, %v524_v41 }
 0x14d   : > { %1081 = vmatpush3.bf16.msra.mxu0 %v1126_v40  ;;  %1088 = vmatprep.mubr.msk.bf16.mxu0 %vm1159_vm1, %v1158_v17 }
 0x14e   : > { %1082 = vmatprep.subr.bf16.mxu0 %v1158_v17 }
 0x151   : > { %1083 = vmatpush3.bf16.msra.mxu0 %v1127_v42 }
 0x152   : > { %1084 = vmatprep.subr.bf16.mxu0 %v1158_v17 }
 0x155   : > { %1085 = vmatpush3.bf16.msra.mxu0 %v1128_v43 }
 0x156   : > { %1086 = vmatprep.subr.bf16.mxu0 %v1158_v17 }
 0x159   : > { %1087 = vmatpush3.bf16.msra.mxu0 %v1129_v44 }
 0x15c   : > { %1089 = vmatmul.mubr.msk.bf16.vlgmr.msra.gmra.mxu0 %vm480_vm0, %v524_v41 }
 0x20c   : > { %v601_v47 = vpop.f32.mrf.mxu0  ;;  %v692_v48 = vpop.f32.mrf.mxu1 }
 0x20d   : > { %v602_v49 = vadd.f32 %v1001_v45, %v601_v47  ;;  %v693_v50 = vadd.f32 %v1009_v46, %v692_v48 }
 0x20e   : > { %v1066_v51 = vpop.f32.mrf.mxu0  ;;  %v1078_v52 = vpop.f32.mrf.mxu1 }
 0x20f   : > { %v1031_v53 = vpack.c.bf16 %v602_v49, %v602_v49  ;;  %v1033_v54 = vpack.c.bf16 %v693_v50, %v693_v50 }
 0x210   : > { %v604_v55 = vpop.f32.mrf.mxu0  ;;  %v695_v56 = vpop.f32.mrf.mxu1 }
 0x211   : > { %617 = vst.msk [vmem:[%s451_s29] sm:$0xf] %vm616_vm2, %v1031_v53  ;;  %707 = vst.msk [vmem:[%s461_s13] sm:$0xf] %vm616_vm2, %v1033_v54  ;;  %v605_v57 = vadd.f32 %v1001_v45, %v604_v55  ;;  %v696_v58 = vadd.f32 %v1009_v46, %v695_v56 }
 0x212   : > { %v1067_v59 = vpop.f32.mrf.mxu0  ;;  %v1079_v60 = vpop.f32.mrf.mxu1 }
 0x213   : > { %v1032_v61 = vpack.c.bf16 %v605_v57, %v605_v57  ;;  %v1034_v62 = vpack.c.bf16 %v696_v58, %v696_v58 }
 0x215   : > { %618 = vst.msk [vmem:[%s451_s29 + $0x4] sm:$0xf] %vm616_vm2, %v1032_v61  ;;  %708 = vst.msk [vmem:[%s461_s13 + $0x4] sm:$0xf] %vm616_vm2, %v1034_v62 }
 0x21c   : > { %v782_v0 = vpop.f32.mrf.mxu0 }
 0x21d   : > { %v783_v1 = vadd.f32 %v1017_v63, %v782_v0 }
 0x21e   : > { %v1090_v2 = vpop.f32.mrf.mxu0 }
 0x21f   : > { %v1035_v3 = vpack.c.bf16 %v783_v1, %v783_v1 }
 0x220   : > { %v785_v4 = vpop.f32.mrf.mxu0 }
 0x221   : > { %797 = vst.msk [vmem:[%s471_s22] sm:$0xf] %vm616_vm2, %v1035_v3  ;;  %v786_v5 = vadd.f32 %v1017_v63, %v785_v4 }
 0x222   : > { %v1091_v6 = vpop.f32.mrf.mxu0 }
 0x223   : > { %v1036_v7 = vpack.c.bf16 %v786_v5, %v786_v5 }
 0x225   : > { %798 = vst.msk [vmem:[%s471_s22 + $0x4] sm:$0xf] %vm616_vm2, %v1036_v7 }
 0x226 PF: > { %s22_s19 = sadd.s32 1, %s1156_s19   ;;  %s1344_s17 = smov %s1152_s18 }
 0x227   : > { %p19_p5 = scmp.ge.s32.totalorder %s22_s19, 4   ;;  %s1345_s18 = smov %s1347_s20 }
 0x229   :  { %21 = sbr.rel (!%p19_p5) target bundleno = 2 (0x2), region = 110 }

// kernel: gpt_lm_forward.14
= control target key start
LH: loop header
LB: loop body
LE: loop exit
PB: predicated region body
PF: predicated region fallthrough
CT: control target
= control target key end

     0   :  { %s453_s12 = smov 0   ;;  %s455_s13 = smov 0   ;;  %s503_s0 = inlined_call_operand.vmem [shape: bf16[2,16,64], index: 0, kind: input, shape index: {}]   ;;  %s504_s1 = inlined_call_operand.vmem [shape: f32[1,64], index: 1, kind: input, shape index: {}]   ;;  %s505_s2 = inlined_call_operand.vmem [shape: f32[1,64], index: 2, kind: input, shape index: {}]   ;;  %s506_s3 = inlined_call_operand.vmem [shape: bf16[2,16,64], index: 3, kind: output, shape index: {}]  }
   0x1   :  { %s457_s14 = smov 0  }
   0x2 LB: > { %s25_s15 = sadd.s32 1, %s427_s13  ;;  %p362_p0 = scmp.ge.s32.totalorder %s431_s14, 1  ;;  %s431_s14 = sphi %s457_s14, %s13_s14   ;;  %s427_s13 = sphi %s455_s13, %s508_s13   ;;  %s423_s12 = sphi %s453_s12, %s507_s12  }
   0x3   : > { %p27_p1 = scmp.ge.s32.totalorder %s25_s15, 2  ;;  %p158_p2 = scmp.lt.s32.totalorder %s431_s14, 3 }
   0x5   : > { %s510_s15 = smov (%p27_p1, %s25_s15), 0  ;;  %p159_p3 = pnand %p362_p0, %p158_p2 }
   0x6   : > { %p191_p4 = scmp.lt.s32.totalorder (!%p159_p3), %s423_s12, 1 }
   0x7   : > { %162 = sbr.rel (%p159_p3) target bundleno = 333 (0x14d), region = 32 }
   0xc   : > { %s512_s12 = smov (!%p191_p4, %s423_s12), 1  ;;  %vm216_vm0 = vcmask 523264   ;;  %v367_v22 = vld [vmem:[%s504_s1] ss:$0 sm:$0xff]  ;;  %vm268_vm1 = vcmask 519168  }
   0xd   : > { %s373_s16 = sshll.u32 %s512_s12, 3  ;;  %v368_v24 = vld [vmem:[%s505_s2] ss:$0 sm:$0xff] }
   0xe   : > { %s198_s19 = scalar_lea.vmem %s503_s0, %s373_s16  ;;  %s208_s26 = scalar_lea.vmem %s506_s3, %s373_s16 }
   0xf   : > { %v378_v0 = vld [vmem:[%s198_s19] sm:$0xff]  }
  0x10   : > { %v379_v1 = vunpack.c.l.bf16 %v378_v0  ;;  %v380_v2 = vunpack.c.h.bf16 %v378_v0 }
  0x12   : > { %v217_v3 = vsel %vm216_vm0, %v379_v1, 0.0  ;;  %v220_v4 = vsel %vm216_vm0, %v380_v2, 0.0 }
  0x13   : > { %218 = vadd.xlane.f32.xlu0 %v217_v3 }
  0x17   : > { %221 = vadd.xlane.f32.xlu0 %v220_v4 }
  0x9c   : > { %v219_v5 = vpop.xlane.xlu0 %218 }
  0x9d   : > { %v224_v6 = vmul.f32 0.015625, %v219_v5 }
  0x9f   : > { %v226_v7 = vsub.f32 %v379_v1, %v224_v6 }
  0xa0   : > { %v222_v8 = vpop.xlane.xlu0 %221 }
  0xa1   : > { %v225_v9 = vmul.f32 0.015625, %v222_v8  ;;  %v228_v10 = vmul.f32 %v226_v7, %v226_v7 }
  0xa3   : > { %v227_v11 = vsub.f32 %v380_v2, %v225_v9  ;;  %v230_v12 = vsel %vm216_vm0, %v228_v10, 0.0 }
  0xa4   : > { %231 = vadd.xlane.f32.xlu1 %v230_v12 }
  0xa5   : > { %v229_v13 = vmul.f32 %v227_v11, %v227_v11 }
  0xa7   : > { %v233_v14 = vsel %vm216_vm0, %v229_v13, 0.0 }
  0xa8   : > { %234 = vadd.xlane.f32.xlu1 %v233_v14 }
 0x12d   : > { %v232_v15 = vpop.xlane.xlu1 %231 }
 0x12e   : > { %v236_v16 = vmul.f32 0.015625, %v232_v15 }
 0x130   : > { %v238_v17 = vadd.f32 1e-05, %v236_v16 }
 0x131   : > { %v235_v18 = vpop.xlane.xlu1 %234 }
 0x132   : > { %405 = vrsqrt.f32 %v238_v17  ;;  %v237_v19 = vmul.f32 0.015625, %v235_v18 }
 0x134   : > { %v239_v20 = vadd.f32 1e-05, %v237_v19 }
 0x136   : > { %407 = vrsqrt.f32 %v239_v20 }
 0x13f   : > { %v406_v21 = vpop.eup %405 }
 0x140   : > { %v242_v23 = vmul.f32 %v406_v21, %v226_v7 }
 0x142   : > { %v250_v25 = vmul.f32 %v367_v22, %v242_v23 }
 0x143   : > { %v408_v26 = vpop.eup %407 }
 0x144   : > { %v258_v27 = vadd.f32 %v368_v24, %v250_v25  ;;  %v243_v28 = vmul.f32 %v408_v26, %v227_v11 }
 0x146   : > { %v375_v29 = vpack.c.bf16 %v258_v27, %v258_v27  ;;  %v251_v30 = vmul.f32 %v367_v22, %v243_v28 }
 0x148   : > { %269 = vst.msk [vmem:[%s208_s26] sm:$0xf] %vm268_vm1, %v375_v29  ;;  %v259_v31 = vadd.f32 %v368_v24, %v251_v30 }
 0x14a   : > { %v376_v32 = vpack.c.bf16 %v259_v31, %v259_v31 }
 0x14c   : > { %270 = vst.msk [vmem:[%s208_s26 + $0x4] sm:$0xf] %vm268_vm1, %v376_v32 }
 0x14d PF: > { %s13_s14 = sadd.s32 1, %s431_s14   ;;  %s507_s12 = smov %s427_s13 }
 0x14e   : > { %p10_p5 = scmp.ge.s32.totalorder %s13_s14, 4   ;;  %s508_s13 = smov %s510_s15 }
 0x150   :  { %12 = sbr.rel (!%p10_p5) target bundleno = 2 (0x2), region = 62 }

// kernel: gpt_lm_forward.10
= control target key start
LH: loop header
LB: loop body
LE: loop exit
PB: predicated region body
PF: predicated region fallthrough
CT: control target
= control target key end

     0   :  { %s1162_s24 = smov 0   ;;  %s1164_s25 = smov 0   ;;  %s1309_s0 = inlined_call_operand.vmem [shape: bf16[2,16,64], index: 0, kind: input, shape index: {}]   ;;  %s1310_s1 = inlined_call_operand.vmem [shape: f32[1,64], index: 1, kind: input, shape index: {}]   ;;  %s1311_s2 = inlined_call_operand.vmem [shape: f32[1,64], index: 2, kind: input, shape index: {}]   ;;  %s1312_s3 = inlined_call_operand.vmem [shape: bf16[64,256], index: 3, kind: input, shape index: {}]   ;;  %s1313_s4 = inlined_call_operand.vmem [shape: f32[1,256], index: 4, kind: input, shape index: {}]   ;;  %s1314_s5 = inlined_call_operand.vmem [shape: bf16[256,64], index: 5, kind: input, shape index: {}]   ;;  %s1315_s6 = inlined_call_operand.vmem [shape: f32[1,64], index: 6, kind: input, shape index: {}]   ;;  %s1316_s7 = inlined_call_operand.vmem [shape: bf16[2,16,64], index: 7, kind: output, shape index: {}]  }
   0x1   :  { %s1166_s26 = smov 0  }
   0x2 LB: > { %s36_s27 = sadd.s32 1, %s1114_s25  ;;  %p953_p0 = scmp.ge.s32.totalorder %s1118_s26, 1  ;;  %s1118_s26 = sphi %s1166_s26, %s17_s26   ;;  %s1114_s25 = sphi %s1164_s25, %s1318_s25   ;;  %s1110_s24 = sphi %s1162_s24, %s1317_s24  }
   0x3   : > { %p38_p1 = scmp.ge.s32.totalorder %s36_s27, 2  ;;  %p297_p2 = scmp.lt.s32.totalorder %s1118_s26, 3 }
   0x5   : > { %s1320_s27 = smov (%p38_p1, %s36_s27), 0  ;;  %p298_p3 = pnand %p953_p0, %p297_p2 }
   0x6   : > { %p352_p4 = scmp.lt.s32.totalorder (!%p298_p3), %s1110_s24, 1 }
   0x7   : > { %301 = sbr.rel (%p298_p3) target bundleno = 790 (0x316), region = 48 }
   0xc   : > { %s1322_s24 = smov (!%p352_p4, %s1110_s24), 1  ;;  %vm399_vm0 = vcmask 523264   ;;  %v1055_v15 = vld [vmem:[%s1312_s3 + $0x34] ss:$8 sps:$4 sm:$0xff]   ;;  %v1057_v16 = vld [vmem:[%s1312_s3 + $0x30] ss:$8 sps:$4 sm:$0xff]   ;;  %v468_v59 = vlaneseq }
   0xd   : > { %s993_s28 = sshll.u32 %s1322_s24, 3  ;;  %535 = vmatprep.subr.bf16.mxu0 %v1055_v15  ;;  %v1058_v17 = vld [vmem:[%s1312_s3 + $0x24] ss:$8 sps:$4 sm:$0xff]   ;;  %v1060_v18 = vld [vmem:[%s1312_s3 + $0x20] ss:$8 sps:$4 sm:$0xff]   ;;  %v1120_v23 = vmov 0  }
   0xe   : > { %s359_s8 = scalar_lea.vmem %s1309_s0, %s993_s28  ;;  %536 = vmatpush1.bf16.msra.mxu0 %v1057_v16  ;;  %v1061_v19 = vld [vmem:[%s1312_s3 + $0x14] ss:$8 sps:$4 sm:$0xff]   ;;  %v1063_v20 = vld [vmem:[%s1312_s3 + $0x10] ss:$8 sps:$4 sm:$0xff]   ;;  %v1064_v21 = vld [vmem:[%s1312_s3 + $0x4] ss:$8 sps:$4 sm:$0xff]   ;;  %559 = vmatprep.mubr.bf16.mxu0 %v1120_v23  ;;  %s386_s13 = scalar_lea.vmem %s1316_s7, %s993_s28 }
   0xf   : > { %v1000_v0 = vld [vmem:[%s359_s8] sm:$0xff]   ;;  %537 = vmatprep.subr.bf16.mxu0 %v1058_v17  ;;  %vm451_vm1 = vcmask 519168   ;;  %v1068_v43 = vld [vmem:[%s1314_s5 + $0x78] sm:$0xff]   ;;  %v1070_v45 = vld [vmem:[%s1314_s5 + $0x70] sm:$0xff]   ;;  %v469_v60 = vshrl.u32 %v468_v59, 7 }
  0x10   : > { %v1188_v1 = vunpack.c.l.bf16 %v1000_v0  ;;  %v1190_v2 = vunpack.c.h.bf16 %v1000_v0  ;;  %v1066_v22 = vld [vmem:[%s1312_s3] ss:$8 sps:$4 sm:$0xff]   ;;  %v1069_v44 = vld [vmem:[%s1314_s5 + $0x38] sm:$0xff]   ;;  %1007 = vmatprep.subr.bf16.mxu1 %v1068_v43  ;;  %v1071_v46 = vld [vmem:[%s1314_s5 + $0x30] sm:$0xff]  }
  0x11   : > { %v958_v31 = vld [vmem:[%s1310_s1] ss:$0 sm:$0xff]  ;;  %1008 = vmatpush3.bf16.msra.mxu1 %v1069_v44  ;;  %v1072_v47 = vld [vmem:[%s1314_s5 + $0x68] sm:$0xff]   ;;  %v1076_v51 = vld [vmem:[%s1314_s5 + $0x58] sm:$0xff]   ;;  %v470_v61 = vsub.s32 0, %v469_v60  ;;  %v474_v63 = vsub.s32 1, %v469_v60 }
  0x12   : > { %v400_v3 = vsel %vm399_vm0, %v1188_v1, 0.0  ;;  %v403_v4 = vsel %vm399_vm0, %v1190_v2, 0.0  ;;  %538 = vmatpush1.bf16.msra.mxu0 %v1060_v18  ;;  %v959_v33 = vld [vmem:[%s1311_s2] ss:$0 sm:$0xff]  ;;  %1009 = vmatprep.subr.bf16.mxu1 %v1070_v45  ;;  %v1073_v48 = vld [vmem:[%s1314_s5 + $0x28] sm:$0xff]   ;;  %v1077_v52 = vld [vmem:[%s1314_s5 + $0x18] sm:$0xff]  }
  0x13   : > { %401 = vadd.xlane.f32.xlu0 %v400_v3  ;;  %539 = vmatprep.subr.bf16.mxu0 %v1061_v19  ;;  %v1074_v49 = vld [vmem:[%s1314_s5 + $0x60] sm:$0xff]   ;;  %v1078_v53 = vld [vmem:[%s1314_s5 + $0x50] sm:$0xff]   ;;  %v1080_v55 = vld [vmem:[%s1314_s5 + $0x48] sm:$0xff]  }
  0x14   : > { %v1075_v50 = vld [vmem:[%s1314_s5 + $0x20] sm:$0xff]   ;;  %v1079_v54 = vld [vmem:[%s1314_s5 + $0x10] sm:$0xff]   ;;  %v1081_v56 = vld [vmem:[%s1314_s5 + $0x8] sm:$0xff]  }
  0x15   : > { %1010 = vmatpush3.bf16.msra.mxu1 %v1071_v46  ;;  %v1082_v57 = vld [vmem:[%s1314_s5 + $0x40] sm:$0xff]  }
  0x16   : > { %540 = vmatpush1.bf16.msra.mxu0 %v1063_v20  ;;  %1011 = vmatprep.subr.bf16.mxu1 %v1072_v47  ;;  %v1083_v58 = vld [vmem:[%s1314_s5] sm:$0xff]  }
  0x17   : > { %404 = vadd.xlane.f32.xlu0 %v403_v4  ;;  %541 = vmatprep.subr.bf16.mxu0 %v1064_v21  ;;  %v466_v62 = vld [vmem:[%s1313_s4] sm:$0x3] }
  0x18   : > { %v471_v0 = vrot.slane %v466_v62, %v470_v61  ;;  %v475_v3 = vrot.slane %v466_v62, %v474_v63  ;;  %v988_v62 = vld [vmem:[%s1315_s6] ss:$0 sm:$0xff] }
  0x19   : > { %1012 = vmatpush3.bf16.msra.mxu1 %v1073_v48 }
  0x1a   : > { %542 = vmatpush1.bf16.msra.mxu0 %v1066_v22  ;;  %1013 = vmatprep.subr.bf16.mxu1 %v1074_v49 }
  0x1d   : > { %1014 = vmatpush3.bf16.msra.mxu1 %v1075_v50  ;;  %v1121_v50 = vmov 0.0  }
  0x1e   : > { %1015 = vmatprep.subr.bf16.mxu1 %v1076_v51  ;;  %454 = vst.msk [vmem:[#allocation3] sm:$0xff] %vm399_vm0, %v1121_v50  ;;  %455 = vst.msk [vmem:[#allocation3 + $0x8] sm:$0xff] %vm399_vm0, %v1121_v50 }
  0x21   : > { %1016 = vmatpush3.bf16.msra.mxu1 %v1077_v52 }
  0x22   : > { %1017 = vmatprep.subr.bf16.mxu1 %v1078_v53 }
  0x25   : > { %1018 = vmatpush3.bf16.msra.mxu1 %v1079_v54  ;;  %v606_v52 = vld [vmem:[#allocation3] sm:$0xff] }
  0x26   : > { %1019 = vmatprep.subr.bf16.mxu1 %v1080_v55 }
  0x29   : > { %1020 = vmatpush3.bf16.msra.mxu1 %v1081_v56 }
  0x2a   : > { %1021 = vmatprep.subr.bf16.mxu1 %v1082_v57  ;;  %v607_v57 = vld [vmem:[#allocation3 + $0x8] sm:$0xff] }
  0x2d   : > { %1022 = vmatpush3.bf16.msra.mxu1 %v1083_v58 }
  0x9c   : > { %v402_v5 = vpop.xlane.xlu0 %401 }
  0x9d   : > { %v407_v6 = vmul.f32 0.015625, %v402_v5 }
  0x9f   : > { %v409_v7 = vsub.f32 %v1188_v1, %v407_v6 }
  0xa0   : > { %v405_v8 = vpop.xlane.xlu0 %404 }
  0xa1   : > { %v408_v9 = vmul.f32 0.015625, %v405_v8  ;;  %v411_v10 = vmul.f32 %v409_v7, %v409_v7 }
  0xa3   : > { %v410_v11 = vsub.f32 %v1190_v2, %v408_v9  ;;  %v413_v12 = vsel %vm399_vm0, %v411_v10, 0.0 }
  0xa4   : > { %414 = vadd.xlane.f32.xlu1 %v413_v12 }
  0xa5   : > { %v412_v13 = vmul.f32 %v410_v11, %v410_v11 }
  0xa7   : > { %v416_v14 = vsel %vm399_vm0, %v412_v13, 0.0 }
  0xa8   : > { %417 = vadd.xlane.f32.xlu1 %v416_v14 }
 0x12d   : > { %v415_v24 = vpop.xlane.xlu1 %414 }
 0x12e   : > { %v419_v25 = vmul.f32 0.015625, %v415_v24 }
 0x130   : > { %v421_v26 = vadd.f32 1e-05, %v419_v25 }
 0x131   : > { %v418_v27 = vpop.xlane.xlu1 %417 }
 0x132   : > { %1084 = vrsqrt.f32 %v421_v26  ;;  %v420_v28 = vmul.f32 0.015625, %v418_v27 }
 0x134   : > { %v422_v29 = vadd.f32 1e-05, %v420_v28 }
 0x136   : > { %1086 = vrsqrt.f32 %v422_v29 }
 0x13f   : > { %v1085_v30 = vpop.eup %1084 }
 0x140   : > { %v425_v32 = vmul.f32 %v1085_v30, %v409_v7 }
 0x142   : > { %v433_v34 = vmul.f32 %v958_v31, %v425_v32 }
 0x143   : > { %v1087_v35 = vpop.eup %1086 }
 0x144   : > { %v441_v36 = vadd.f32 %v959_v33, %v433_v34  ;;  %v426_v37 = vmul.f32 %v1087_v35, %v410_v11 }
 0x146   : > { %v995_v38 = vpack.c.bf16 %v441_v36, %v441_v36  ;;  %v434_v39 = vmul.f32 %v958_v31, %v426_v37 }
 0x148   : > { %452 = vst.msk [vmem:[#allocation2] sm:$0xf] %vm451_vm1, %v995_v38  ;;  %v442_v40 = vadd.f32 %v959_v33, %v434_v39 }
 0x14a   : > { %v996_v41 = vpack.c.bf16 %v442_v40, %v442_v40 }
 0x14c   : > { %453 = vst.msk [vmem:[#allocation2 + $0x4] sm:$0xf] %vm451_vm1, %v996_v41 }
 0x153   : > { %v1067_v42 = vld [vmem:[#allocation2] sm:$0xff]  }
 0x154   : > { %971 = vmatmul.mubr.msk.bf16.vlgmr.msra.gmra.mxu0 %vm399_vm0, %v1067_v42 }
 0x214   : > { %v561_v4 = vpop.f32.mrf.mxu0 }
 0x215   : > { %v562_v5 = vadd.f32 %v561_v4, %v471_v0 }
 0x216   : > { %v563_v6 = vpop.f32.mrf.mxu0 }
 0x217   : > { %v574_v7 = vmul.f32 0.044715, %v562_v5  ;;  %v564_v8 = vadd.f32 %v563_v6, %v475_v3  ;;  %v570_v43 = vmul.f32 0.5, %v562_v5 }
 0x218   : > { %v565_v9 = vpop.f32.mrf.mxu0 }
 0x219   : > { %v578_v10 = vmul.f32 %v574_v7, %v562_v5  ;;  %v575_v11 = vmul.f32 0.044715, %v564_v8  ;;  %v566_v12 = vadd.f32 %v565_v9, %v471_v0  ;;  %v571_v40 = vmul.f32 0.5, %v564_v8 }
 0x21a   : > { %v567_v13 = vpop.f32.mrf.mxu0 }
 0x21b   : > { %v582_v14 = vmul.f32 %v578_v10, %v562_v5  ;;  %v576_v15 = vmul.f32 0.044715, %v566_v12  ;;  %v568_v16 = vadd.f32 %v567_v13, %v475_v3  ;;  %v579_v17 = vmul.f32 %v575_v11, %v564_v8 }
 0x21c   : > { %v572_v38 = vmul.f32 0.5, %v566_v12 }
 0x21d   : > { %v580_v18 = vmul.f32 %v576_v15, %v566_v12  ;;  %v577_v19 = vmul.f32 0.044715, %v568_v16  ;;  %v583_v20 = vmul.f32 %v579_v17, %v564_v8  ;;  %v586_v21 = vadd.f32 %v582_v14, %v562_v5 }
 0x21e   : > { %v573_v41 = vmul.f32 0.5, %v568_v16 }
 0x21f   : > { %v584_v22 = vmul.f32 %v580_v18, %v566_v12  ;;  %v581_v23 = vmul.f32 %v577_v19, %v568_v16  ;;  %v587_v24 = vadd.f32 %v583_v20, %v564_v8  ;;  %v590_v25 = vmul.f32 0.7978846, %v586_v21 }
 0x221   : > { %v585_v26 = vmul.f32 %v581_v23, %v568_v16  ;;  %v591_v27 = vmul.f32 0.7978846, %v587_v24  ;;  %v588_v28 = vadd.f32 %v584_v22, %v566_v12 }
 0x223   : > { %v589_v29 = vadd.f32 %v585_v26, %v568_v16  ;;  %1088 = vtanh.f32 %v591_v27  ;;  %v592_v30 = vmul.f32 0.7978846, %v588_v28 }
 0x224   : > { %1090 = vtanh.f32 %v590_v25 }
 0x225   : > { %v593_v31 = vmul.f32 0.7978846, %v589_v29  ;;  %1092 = vtanh.f32 %v592_v30 }
 0x227   : > { %1094 = vtanh.f32 %v593_v31 }
 0x230   : > { %v1089_v32 = vpop.eup %1088 }
 0x231   : > { %v1091_v33 = vpop.eup %1090  ;;  %v599_v35 = vadd.f32 1.0, %v1089_v32 }
 0x232   : > { %v1093_v34 = vpop.eup %1092  ;;  %v598_v39 = vadd.f32 1.0, %v1091_v33 }
 0x233   : > { %v600_v36 = vadd.f32 1.0, %v1093_v34  ;;  %v603_v45 = vmul.f32 %v599_v35, %v571_v40 }
 0x234   : > { %v1095_v37 = vpop.eup %1094  ;;  %v602_v47 = vmul.f32 %v598_v39, %v570_v43 }
 0x235   : > { %v601_v42 = vadd.f32 1.0, %v1095_v37  ;;  %v604_v44 = vmul.f32 %v600_v36, %v572_v38 }
 0x237   : > { %v605_v46 = vmul.f32 %v601_v42, %v573_v41  ;;  %v608_v49 = vpack.c.bf16 %v604_v44, %v602_v47 }
 0x239   : > { %v609_v48 = vpack.c.bf16 %v605_v46, %v603_v45 }
 0x23b   : > { %770 = vmatprep.mubr.bf16.mxu1 %v609_v48 }
 0x23c   : > { %771 = vmatmul.mubr.bf16.vlgmr.msra.gmra.mxu1 %v608_v49 }
 0x2fc   : > { %v1023_v51 = vpop.f32.mrf.mxu1 }
 0x2fe   : > { %v1024_v53 = vpop.f32.mrf.mxu1 }
 0x2ff   : > { %v1025_v54 = vadd.f32 %v1024_v53, %v1023_v51 }
 0x300   : > { %v1026_v55 = vpop.f32.mrf.mxu1 }
 0x301   : > { %v779_v56 = vadd.f32 %v1025_v54, %v606_v52 }
 0x302   : > { %v1027_v58 = vpop.f32.mrf.mxu1 }
 0x303   : > { %781 = vst.msk [vmem:[#allocation3] sm:$0xff] %vm399_vm0, %v779_v56  ;;  %v1028_v59 = vadd.f32 %v1027_v58, %v1026_v55 }
 0x305   : > { %v780_v60 = vadd.f32 %v1028_v59, %v607_v57 }
 0x307   : > { %782 = vst.msk [vmem:[#allocation3 + $0x8] sm:$0xff] %vm399_vm0, %v780_v60 }
 0x30a   : > { %v790_v61 = vld [vmem:[#allocation3] sm:$0xff] }
 0x30b   : > { %v792_v63 = vadd.f32 %v1188_v1, %v790_v61 }
 0x30d   : > { %v801_v0 = vadd.f32 %v988_v62, %v792_v63 }
 0x30e   : > { %v791_v3 = vld [vmem:[#allocation3 + $0x8] sm:$0xff] }
 0x30f   : > { %v997_v4 = vpack.c.bf16 %v801_v0, %v801_v0  ;;  %v793_v5 = vadd.f32 %v1190_v2, %v791_v3 }
 0x311   : > { %812 = vst.msk [vmem:[%s386_s13] sm:$0xf] %vm451_vm1, %v997_v4  ;;  %v802_v6 = vadd.f32 %v988_v62, %v793_v5 }
 0x313   : > { %v998_v7 = vpack.c.bf16 %v802_v6, %v802_v6 }
 0x315   : > { %813 = vst.msk [vmem:[%s386_s13 + $0x4] sm:$0xf] %vm451_vm1, %v998_v7 }
 0x316 PF: > { %s17_s26 = sadd.s32 1, %s1118_s26   ;;  %s1317_s24 = smov %s1114_s25 }
 0x317   : > { %p14_p5 = scmp.ge.s32.totalorder %s17_s26, 4   ;;  %s1318_s25 = smov %s1320_s27 }
 0x319   :  { %16 = sbr.rel (!%p14_p5) target bundleno = 2 (0x2), region = 95 }

// kernel: gpt_lm_forward.9
= control target key start
LH: loop header
LB: loop body
LE: loop exit
PB: predicated region body
PF: predicated region fallthrough
CT: control target
= control target key end

     0   :  { %s1675_s24 = smov 0   ;;  %s1677_s25 = smov 0   ;;  %s1850_s0 = inlined_call_operand.vmem [shape: bf16[2,16,64], index: 0, kind: input, shape index: {}]   ;;  %s1851_s1 = inlined_call_operand.vmem [shape: bf16[2,4,16,16], index: 1, kind: input, shape index: {}]   ;;  %s1852_s2 = inlined_call_operand.vmem [shape: bf16[2,4,16,16], index: 2, kind: input, shape index: {}]   ;;  %s1853_s3 = inlined_call_operand.vmem [shape: bf16[2,4,16,16], index: 3, kind: input, shape index: {}]   ;;  %s1854_s4 = inlined_call_operand.vmem [shape: f32[2,1,16], index: 4, kind: input, shape index: {}]   ;;  %s1855_s5 = inlined_call_operand.vmem [shape: bf16[4,16,64], index: 5, kind: input, shape index: {}]   ;;  %s1856_s6 = inlined_call_operand.vmem [shape: f32[1,64], index: 6, kind: input, shape index: {}]   ;;  %s1857_s7 = inlined_call_operand.vmem [shape: bf16[2,16,64], index: 7, kind: output, shape index: {}]  }
   0x1   :  { %s1679_s26 = smov 0  }
   0x2 LB: > { %s29_s27 = sadd.s32 1, %s1626_s25  ;;  %p1382_p0 = scmp.ge.s32.totalorder %s1630_s26, 1  ;;  %s1630_s26 = sphi %s1679_s26, %s17_s26   ;;  %s1626_s25 = sphi %s1677_s25, %s1863_s25   ;;  %s1622_s24 = sphi %s1675_s24, %s1862_s24  }
   0x3   : > { %p31_p1 = scmp.ge.s32.totalorder %s29_s27, 2  ;;  %p303_p2 = scmp.lt.s32.totalorder %s1630_s26, 3 }
   0x5   : > { %s1865_s27 = smov (%p31_p1, %s29_s27), 0  ;;  %p304_p3 = pnand %p1382_p0, %p303_p2 }
   0x6   : > { %p366_p4 = scmp.lt.s32.totalorder (!%p304_p3), %s1622_s24, 1 }
   0x7   : > { %307 = sbr.rel (%p304_p3) target bundleno = 801 (0x321), region = 48 }
   0xc   : > { %v1632_v0 = vmov 0.0   ;;  %s1867_s24 = smov (!%p366_p4, %s1622_s24), 1  ;;  %vm1633_vm0 = vmmov 0   ;;  %vm443_vm1 = vcmask 130048   ;;  %v663_v13 = vlaneseq }
   0xd   : > { %1461 = vmatprep.subr.bf16.mxu0 %v1632_v0  ;;  %1467 = vmatprep.subr.bf16.mxu1 %v1632_v0  ;;  %s1427_s28 = sshll.u32 %s1867_s24, 5  ;;  %s397_s17 = scalar_lea.vmem %s1854_s4, %s1867_s24  ;;  %v1634_v17 = vmov 0   ;;  %vm1199_vm8 = vcmask 523264   ;;  %vm1237_vm9 = vcmask 519168  }
   0xe   : > { %1463 = vmatprep.mubr.msk.bf16.mxu0 %vm1633_vm0, %v1632_v0  ;;  %1469 = vmatprep.mubr.msk.bf16.mxu1 %vm1633_vm0, %v1632_v0  ;;  %s389_s8 = scalar_lea.vmem %s1852_s2, %s1427_s28  ;;  %s383_s11 = scalar_lea.vmem %s1851_s1, %s1427_s28  ;;  %v671_v14 = vld [vmem:[%s397_s17] sm:$0x1]  ;;  %v664_v15 = vshrl.u32 %v663_v13, 7  ;;  %v670_v19 = vand.u32 127, %v663_v13 }
   0xf   : > { %v1560_v1 = vld [vmem:[%s389_s8] sm:$0xff]   ;;  %v1561_v2 = vld [vmem:[%s389_s8 + $0x8] sm:$0xff]   ;;  %v1564_v6 = vld [vmem:[%s389_s8 + $0x10] sm:$0xff]   ;;  %s1715_s14 = scalar_lea.vmem %s1853_s3, %s1427_s28  ;;  %vm672_vm2 = vcmp.gt.f32.partialorder %v671_v14, 0.5  ;;  %s1426_s30 = sshll.u32 %s1867_s24, 3 }
  0x10   : > { %v448_v3 = vsel %vm443_vm1, %v1560_v1, 0  ;;  %v505_v4 = vsel %vm443_vm1, %v1561_v2, 0  ;;  %v1562_v5 = vld [vmem:[%s383_s11] sm:$0xff]   ;;  %v1565_v7 = vld [vmem:[%s389_s8 + $0x18] sm:$0xff]   ;;  %v1563_v8 = vld [vmem:[%s383_s11 + $0x8] sm:$0xff]   ;;  %v562_v9 = vsel %vm443_vm1, %v1564_v6, 0  ;;  %vm673_vm3 = vcmp.ge.s32.totalorder %v664_v15, %v670_v19  ;;  %s373_s10 = scalar_lea.vmem %s1850_s0, %s1426_s30  ;;  %s406_s15 = scalar_lea.vmem %s1857_s7, %s1426_s30 }
  0x11   : > { %1462 = vmatpush3.bf16.xpose.msra.mxu0 %v448_v3  ;;  %1468 = vmatpush3.bf16.xpose.msra.mxu1 %v505_v4  ;;  %v619_v10 = vsel %vm443_vm1, %v1565_v7, 0  ;;  %v1566_v11 = vld [vmem:[%s383_s11 + $0x10] sm:$0xff]   ;;  %v1567_v12 = vld [vmem:[%s383_s11 + $0x18] sm:$0xff]   ;;  %v678_v16 = vsub.s32 0, %v664_v15  ;;  %v675_v18 = vsel %vm672_vm2, 1, %v1634_v17  ;;  %v665_v21 = vadd.s32 8, %v664_v15 }
  0x12   : > { %1473 = vmatprep.subr.bf16.mxu0 %v1632_v0  ;;  %1479 = vmatprep.subr.bf16.mxu1 %v1632_v0  ;;  %v1568_v56 = vld [vmem:[%s1715_s14] sm:$0xff]   ;;  %v1569_v57 = vld [vmem:[%s1715_s14 + $0x8] sm:$0xff]  }
  0x13   : > { %v679_v20 = vrot.slane %v675_v18, %v678_v16  ;;  %vm674_vm6 = vcmp.ge.s32.totalorder %v665_v21, %v670_v19 }
  0x15   : > { %vm680_vm4 = vcmp.eq.s32.totalorder %v679_v20, 1 }
  0x16   : > { %vm1737_vm5 = vmand %vm673_vm3, %vm680_vm4 }
  0x17   : > { %vm1746_vm7 = vmand %vm674_vm6, %vm680_vm4 }
  0x18   : > { %1464 = vmatmul.mubr.msk.bf16.vlgmr.msra.gmra.mxu0 %vm443_vm1, %v1562_v5  ;;  %1470 = vmatmul.mubr.msk.bf16.vlgmr.msra.gmra.mxu1 %vm443_vm1, %v1563_v8 }
  0x19   : > { %1474 = vmatpush3.bf16.xpose.msra.mxu0 %v562_v9  ;;  %1480 = vmatpush3.bf16.xpose.msra.mxu1 %v619_v10 }
  0x1a   : > { %1475 = vmatprep.mubr.msk.bf16.mxu0 %vm1633_vm0, %v1632_v0  ;;  %1481 = vmatprep.mubr.msk.bf16.mxu1 %vm1633_vm0, %v1632_v0 }
  0x1b   : > { %1485 = vmatprep.subr.bf16.mxu0 %v1632_v0  ;;  %1491 = vmatprep.subr.bf16.mxu1 %v1632_v0 }
  0x20   : > { %1476 = vmatmul.mubr.msk.bf16.vlgmr.msra.gmra.mxu0 %vm443_vm1, %v1566_v11  ;;  %1482 = vmatmul.mubr.msk.bf16.vlgmr.msra.gmra.mxu1 %vm443_vm1, %v1567_v12 }
  0x21   : > { %1487 = vmatprep.mubr.msk.bf16.mxu0 %vm1633_vm0, %v1632_v0  ;;  %1493 = vmatprep.mubr.msk.bf16.mxu1 %vm1633_vm0, %v1632_v0 }
  0x22   : > { %1486 = vmatpush3.bf16.msra.mxu0 %v1568_v56  ;;  %1492 = vmatpush3.bf16.msra.mxu1 %v1569_v57 }
  0x23   : > { %1497 = vmatprep.subr.bf16.mxu0 %v1632_v0  ;;  %1503 = vmatprep.subr.bf16.mxu1 %v1632_v0 }
  0xd8   : > { %v484_v23 = vpop.f32.mrf.mxu0  ;;  %v541_v25 = vpop.f32.mrf.mxu1 }
  0xd9   : > { %v687_v24 = vsel %vm1737_vm5, %v484_v23, -1e+30  ;;  %v689_v26 = vsel %vm1737_vm5, %v541_v25, -1e+30  ;;  %v1570_v23 = vld [vmem:[%s1715_s14 + $0x10] sm:$0xff]  }
  0xda   : > { %v1465_v27 = vpop.f32.mrf.mxu0  ;;  %v695_v28 = vsel %vm443_vm1, %v687_v24, -inf  ;;  %v1471_v30 = vpop.f32.mrf.mxu1  ;;  %v701_v31 = vsel %vm443_vm1, %v689_v26, -inf }
  0xdb   : > { %696 = vmax.xlane.f32.xlu0 %v695_v28  ;;  %702 = vmax.xlane.f32.xlu1 %v701_v31  ;;  %v1571_v28 = vld [vmem:[%s1715_s14 + $0x18] sm:$0xff]  }
  0xdc   : > { %v487_v32 = vpop.f32.mrf.mxu0  ;;  %v544_v34 = vpop.f32.mrf.mxu1 }
  0xdd   : > { %v688_v33 = vsel %vm1746_vm7, %v487_v32, -1e+30  ;;  %v690_v35 = vsel %vm1746_vm7, %v544_v34, -1e+30 }
  0xde   : > { %v1466_v36 = vpop.f32.mrf.mxu0  ;;  %v698_v37 = vsel %vm443_vm1, %v688_v33, -inf  ;;  %v1472_v38 = vpop.f32.mrf.mxu1  ;;  %v704_v39 = vsel %vm443_vm1, %v690_v35, -inf }
  0xdf   : > { %699 = vmax.xlane.f32.xlu0 %v698_v37  ;;  %705 = vmax.xlane.f32.xlu1 %v704_v39 }
  0xe0   : > { %v598_v40 = vpop.f32.mrf.mxu0  ;;  %v655_v42 = vpop.f32.mrf.mxu1 }
  0xe1   : > { %v691_v41 = vsel %vm1737_vm5, %v598_v40, -1e+30  ;;  %v693_v43 = vsel %vm1737_vm5, %v655_v42, -1e+30  ;;  %v1573_v42 = vld [vmem:[%s1855_s5 + $0x8] sm:$0xff]  }
  0xe2   : > { %v1477_v44 = vpop.f32.mrf.mxu0  ;;  %v707_v45 = vsel %vm443_vm1, %v691_v41, -inf  ;;  %v1483_v46 = vpop.f32.mrf.mxu1  ;;  %v713_v48 = vsel %vm443_vm1, %v693_v43, -inf }
  0xe3   : > { %708 = vmax.xlane.f32.xlu0 %v707_v45 }
  0xe4   : > { %v601_v47 = vpop.f32.mrf.mxu0  ;;  %v658_v50 = vpop.f32.mrf.mxu1 }
  0xe5   : > { %v692_v49 = vsel %vm1746_vm7, %v601_v47, -1e+30  ;;  %v694_v53 = vsel %vm1746_vm7, %v658_v50, -1e+30 }
  0xe6   : > { %v1478_v51 = vpop.f32.mrf.mxu0  ;;  %v710_v52 = vsel %vm443_vm1, %v692_v49, -inf  ;;  %v1484_v54 = vpop.f32.mrf.mxu1  ;;  %v716_v55 = vsel %vm443_vm1, %v694_v53, -inf }
  0xe7   : > { %714 = vmax.xlane.f32.xlu0 %v713_v48  ;;  %711 = vmax.xlane.f32.xlu1 %v710_v52 }
  0xeb   : > { %717 = vmax.xlane.f32.xlu1 %v716_v55 }
 0x164   : > { %v697_v58 = vpop.xlane.xlu0 %696  ;;  %v703_v59 = vpop.xlane.xlu1 %702 }
 0x165   : > { %v719_v60 = vsub.f32 %v687_v24, %v697_v58  ;;  %v721_v61 = vsub.f32 %v689_v26, %v703_v59 }
 0x167   : > { %v727_v62 = vmul.f32 1.442695, %v719_v60  ;;  %v731_v63 = vmul.f32 1.442695, %v721_v61 }
 0x168   : > { %v700_v1 = vpop.xlane.xlu0 %699  ;;  %v706_v2 = vpop.xlane.xlu1 %705 }
 0x169   : > { %1576 = vpow2.f32 %v727_v62  ;;  %v720_v3 = vsub.f32 %v688_v33, %v700_v1  ;;  %v722_v4 = vsub.f32 %v690_v35, %v706_v2 }
 0x16a   : > { %1578 = vpow2.f32 %v731_v63 }
 0x16b   : > { %v729_v5 = vmul.f32 1.442695, %v720_v3  ;;  %v733_v6 = vmul.f32 1.442695, %v722_v4  ;;  %v1574_v3 = vld [vmem:[%s1855_s5 + $0x10] sm:$0xff]  }
 0x16c   : > { %v709_v7 = vpop.xlane.xlu0 %708 }
 0x16d   : > { %1580 = vpow2.f32 %v729_v5  ;;  %v723_v8 = vsub.f32 %v691_v41, %v709_v7  ;;  %v1572_v41 = vld [vmem:[%s1855_s5] sm:$0xff]  }
 0x16e   : > { %1582 = vpow2.f32 %v733_v6  ;;  %v1575_v6 = vld [vmem:[%s1855_s5 + $0x18] sm:$0xff]  }
 0x16f   : > { %v735_v9 = vmul.f32 1.442695, %v723_v8 }
 0x170   : > { %v715_v10 = vpop.xlane.xlu0 %714  ;;  %v712_v11 = vpop.xlane.xlu1 %711 }
 0x171   : > { %1584 = vpow2.f32 %v735_v9  ;;  %v725_v12 = vsub.f32 %v693_v43, %v715_v10  ;;  %v724_v13 = vsub.f32 %v692_v49, %v712_v11 }
 0x173   : > { %v739_v14 = vmul.f32 1.442695, %v725_v12  ;;  %v737_v15 = vmul.f32 1.442695, %v724_v13 }
 0x174   : > { %v718_v16 = vpop.xlane.xlu1 %717 }
 0x175   : > { %1586 = vpow2.f32 %v739_v14  ;;  %v726_v17 = vsub.f32 %v694_v53, %v718_v16 }
 0x176   : > { %v1577_v18 = vpop.eup %1576  ;;  %1588 = vpow2.f32 %v737_v15 }
 0x177   : > { %v741_v19 = vmul.f32 1.442695, %v726_v17  ;;  %v743_v20 = vsel %vm443_vm1, %v1577_v18, 0.0  ;;  %v1579_v21 = vpop.eup %1578 }
 0x178   : > { %744 = vadd.xlane.f32.xlu0 %v743_v20  ;;  %v749_v25 = vsel %vm443_vm1, %v1579_v21, 0.0 }
 0x179   : > { %1590 = vpow2.f32 %v741_v19 }
 0x17a   : > { %v1581_v22 = vpop.eup %1580 }
 0x17b   : > { %v1583_v24 = vpop.eup %1582  ;;  %v746_v26 = vsel %vm443_vm1, %v1581_v22, 0.0  ;;  %v767_v27 = vpack.c.bf16 %v1581_v22, %v1577_v18 }
 0x17c   : > { %750 = vadd.xlane.f32.xlu0 %v749_v25  ;;  %747 = vadd.xlane.f32.xlu1 %v746_v26  ;;  %v768_v29 = vpack.c.bf16 %v1583_v24, %v1579_v21  ;;  %v752_v32 = vsel %vm443_vm1, %v1583_v24, 0.0 }
 0x17d   : > { %1488 = vmatmul.mubr.msk.bf16.vlgmr.msra.gmra.mxu0 %vm443_vm1, %v767_v27 }
 0x17e   : > { %v1585_v30 = vpop.eup %1584  ;;  %1494 = vmatmul.mubr.msk.bf16.vlgmr.msra.gmra.mxu1 %vm443_vm1, %v768_v29  ;;  %1498 = vmatpush3.bf16.msra.mxu0 %v1570_v23 }
 0x17f   : > { %v755_v31 = vsel %vm443_vm1, %v1585_v30, 0.0  ;;  %1504 = vmatpush3.bf16.msra.mxu1 %v1571_v28  ;;  %1499 = vmatprep.mubr.msk.bf16.mxu0 %vm1633_vm0, %v1632_v0 }
 0x180   : > { %756 = vadd.xlane.f32.xlu0 %v755_v31  ;;  %753 = vadd.xlane.f32.xlu1 %v752_v32 }
 0x181   : > { %1505 = vmatprep.mubr.msk.bf16.mxu1 %vm1633_vm0, %v1632_v0  ;;  %1509 = vmatprep.subr.bf16.mxu0 %v1632_v0 }
 0x182   : > { %v1587_v33 = vpop.eup %1586  ;;  %1515 = vmatprep.subr.bf16.mxu1 %v1632_v0 }
 0x183   : > { %v1589_v34 = vpop.eup %1588  ;;  %v761_v35 = vsel %vm443_vm1, %v1587_v33, 0.0 }
 0x184   : > { %762 = vadd.xlane.f32.xlu0 %v761_v35  ;;  %v758_v36 = vsel %vm443_vm1, %v1589_v34, 0.0  ;;  %v769_v37 = vpack.c.bf16 %v1589_v34, %v1585_v30 }
 0x185   : > { %759 = vadd.xlane.f32.xlu1 %v758_v36 }
 0x186   : > { %v1591_v38 = vpop.eup %1590  ;;  %1500 = vmatmul.mubr.msk.bf16.vlgmr.msra.gmra.mxu0 %vm443_vm1, %v769_v37 }
 0x187   : > { %v764_v39 = vsel %vm443_vm1, %v1591_v38, 0.0  ;;  %v770_v40 = vpack.c.bf16 %v1591_v38, %v1587_v33  ;;  %1511 = vmatprep.mubr.msk.bf16.mxu0 %vm1633_vm0, %v1632_v0  ;;  %1510 = vmatpush3.bf16.msra.mxu0 %v1572_v41  ;;  %v1434_v41 = vld [vmem:[%s373_s10] sm:$0xff]  }
 0x188   : > { %1521 = vmatprep.subr.bf16.mxu0 %v1632_v0 }
 0x189   : > { %765 = vadd.xlane.f32.xlu1 %v764_v39  ;;  %1506 = vmatmul.mubr.msk.bf16.vlgmr.msra.gmra.mxu1 %vm443_vm1, %v770_v40 }
 0x18a   : > { %1517 = vmatprep.mubr.msk.bf16.mxu1 %vm1633_vm0, %v1632_v0  ;;  %1516 = vmatpush3.bf16.msra.mxu1 %v1573_v42 }
 0x18b   : > { %1527 = vmatprep.subr.bf16.mxu1 %v1632_v0 }
 0x201   : > { %v745_v43 = vpop.xlane.xlu0 %744 }
 0x202   : > { %1592 = vrcp.f32 %v745_v43 }
 0x205   : > { %v748_v44 = vpop.xlane.xlu1 %747  ;;  %v751_v45 = vpop.xlane.xlu0 %750 }
 0x206   : > { %1594 = vrcp.f32 %v751_v45 }
 0x207   : > { %1596 = vrcp.f32 %v748_v44 }
 0x209   : > { %v754_v46 = vpop.xlane.xlu1 %753  ;;  %v757_v47 = vpop.xlane.xlu0 %756 }
 0x20a   : > { %1598 = vrcp.f32 %v754_v46  ;;  %v1421_v46 = vld [vmem:[%s1856_s6] ss:$0 sm:$0xff] }
 0x20b   : > { %1600 = vrcp.f32 %v757_v47 }
 0x20d   : > { %v763_v49 = vpop.xlane.xlu0 %762 }
 0x20e   : > { %v760_v48 = vpop.xlane.xlu1 %759 }
 0x20f   : > { %1602 = vrcp.f32 %v760_v48  ;;  %v1593_v53 = vpop.eup %1592 }
 0x210   : > { %1604 = vrcp.f32 %v763_v49 }
 0x212   : > { %v766_v50 = vpop.xlane.xlu1 %765 }
 0x213   : > { %v1595_v55 = vpop.eup %1594  ;;  %1606 = vrcp.f32 %v766_v50  ;;  %v1435_v50 = vunpack.c.l.bf16 %v1434_v41 }
 0x214   : > { %v1597_v57 = vpop.eup %1596 }
 0x217   : > { %v1599_v59 = vpop.eup %1598 }
 0x218   : > { %v1601_v10 = vpop.eup %1600 }
 0x21c   : > { %v1603_v12 = vpop.eup %1602 }
 0x21d   : > { %v1605_v17 = vpop.eup %1604 }
 0x220   : > { %v1607_v19 = vpop.eup %1606 }
 0x23d   : > { %v822_v51 = vpop.f32.mrf.mxu0 }
 0x23e   : > { %v872_v52 = vpop.f32.mrf.mxu1  ;;  %v979_v60 = vmul.f32 %v1593_v53, %v822_v51 }
 0x23f   : > { %v1489_v54 = vpop.f32.mrf.mxu0  ;;  %v981_v63 = vmul.f32 %v1595_v55, %v872_v52 }
 0x240   : > { %v1495_v56 = vpop.f32.mrf.mxu1 }
 0x241   : > { %v825_v58 = vpop.f32.mrf.mxu0 }
 0x242   : > { %v980_v61 = vmul.f32 %v1597_v57, %v825_v58  ;;  %v875_v62 = vpop.f32.mrf.mxu1 }
 0x243   : > { %v982_v1 = vmul.f32 %v1599_v59, %v875_v62  ;;  %v1490_v2 = vpop.f32.mrf.mxu0  ;;  %v1436_v59 = vunpack.c.h.bf16 %v1434_v41 }
 0x244   : > { %v987_v4 = vpack.c.bf16 %v980_v61, %v979_v60  ;;  %v1496_v5 = vpop.f32.mrf.mxu1 }
 0x245   : > { %v988_v7 = vpack.c.bf16 %v982_v1, %v981_v63 }
 0x246   : > { %v922_v8 = vpop.f32.mrf.mxu0  ;;  %1512 = vmatmul.mubr.msk.bf16.vlgmr.msra.gmra.mxu0 %vm443_vm1, %v987_v4 }
 0x247   : > { %1518 = vmatmul.mubr.msk.bf16.vlgmr.msra.gmra.mxu1 %vm443_vm1, %v988_v7  ;;  %1522 = vmatpush3.bf16.msra.mxu0 %v1574_v3  ;;  %v983_v14 = vmul.f32 %v1601_v10, %v922_v8 }
 0x248   : > { %v1501_v9 = vpop.f32.mrf.mxu0  ;;  %1528 = vmatpush3.bf16.msra.mxu1 %v1575_v6  ;;  %1523 = vmatprep.mubr.msk.bf16.mxu0 %vm1633_vm0, %v1632_v0 }
 0x249   : > { %v972_v11 = vpop.f32.mrf.mxu1  ;;  %1529 = vmatprep.mubr.msk.bf16.mxu1 %vm1633_vm0, %v1632_v0 }
 0x24a   : > { %v925_v13 = vpop.f32.mrf.mxu0  ;;  %v985_v22 = vmul.f32 %v1605_v17, %v972_v11 }
 0x24b   : > { %v984_v15 = vmul.f32 %v1603_v12, %v925_v13  ;;  %v1507_v16 = vpop.f32.mrf.mxu1 }
 0x24c   : > { %v1502_v18 = vpop.f32.mrf.mxu0 }
 0x24d   : > { %v989_v20 = vpack.c.bf16 %v984_v15, %v983_v14  ;;  %v975_v21 = vpop.f32.mrf.mxu1 }
 0x24e   : > { %v986_v23 = vmul.f32 %v1607_v19, %v975_v21 }
 0x24f   : > { %1524 = vmatmul.mubr.msk.bf16.vlgmr.msra.gmra.mxu0 %vm443_vm1, %v989_v20  ;;  %v1508_v24 = vpop.f32.mrf.mxu1 }
 0x250   : > { %v990_v25 = vpack.c.bf16 %v986_v23, %v985_v22 }
 0x252   : > { %1530 = vmatmul.mubr.msk.bf16.vlgmr.msra.gmra.mxu1 %vm443_vm1, %v990_v25 }
 0x306   : > { %v1042_v0 = vpop.f32.mrf.mxu0 }
 0x307   : > { %v1092_v26 = vpop.f32.mrf.mxu1  ;;  %v1200_v32 = vsel %vm1199_vm8, %v1042_v0, 0.0 }
 0x308   : > { %v1513_v27 = vpop.f32.mrf.mxu0  ;;  %v1201_v33 = vsel %vm1199_vm8, %v1092_v26, 0.0 }
 0x309   : > { %v1519_v28 = vpop.f32.mrf.mxu1  ;;  %v1202_v36 = vadd.f32 %v1201_v33, %v1200_v32 }
 0x30a   : > { %v1045_v29 = vpop.f32.mrf.mxu0 }
 0x30b   : > { %v1095_v30 = vpop.f32.mrf.mxu1  ;;  %v1207_v38 = vsel %vm1199_vm8, %v1045_v29, 0.0 }
 0x30c   : > { %v1514_v31 = vpop.f32.mrf.mxu0  ;;  %v1208_v39 = vsel %vm1199_vm8, %v1095_v30, 0.0 }
 0x30d   : > { %v1520_v34 = vpop.f32.mrf.mxu1  ;;  %v1209_v47 = vadd.f32 %v1208_v39, %v1207_v38 }
 0x30f   : > { %v1142_v35 = vpop.f32.mrf.mxu0 }
 0x310   : > { %v1203_v37 = vsel %vm1199_vm8, %v1142_v35, 0.0 }
 0x311   : > { %v1525_v40 = vpop.f32.mrf.mxu0  ;;  %v1204_v42 = vadd.f32 %v1203_v37, %v1202_v36 }
 0x312   : > { %v1192_v43 = vpop.f32.mrf.mxu1 }
 0x313   : > { %v1145_v44 = vpop.f32.mrf.mxu0  ;;  %v1205_v45 = vsel %vm1199_vm8, %v1192_v43, 0.0 }
 0x314   : > { %v1210_v48 = vsel %vm1199_vm8, %v1145_v44, 0.0  ;;  %v1206_v49 = vadd.f32 %v1205_v45, %v1204_v42  ;;  %v1531_v51 = vpop.f32.mrf.mxu1 }
 0x315   : > { %v1526_v52 = vpop.f32.mrf.mxu0  ;;  %v1211_v53 = vadd.f32 %v1210_v48, %v1209_v47 }
 0x316   : > { %v1221_v54 = vadd.f32 %v1421_v46, %v1206_v49  ;;  %v1195_v55 = vpop.f32.mrf.mxu1 }
 0x317   : > { %v1212_v56 = vsel %vm1199_vm8, %v1195_v55, 0.0 }
 0x318   : > { %v1227_v57 = vadd.f32 %v1435_v50, %v1221_v54  ;;  %v1213_v58 = vadd.f32 %v1212_v56, %v1211_v53  ;;  %v1532_v60 = vpop.f32.mrf.mxu1 }
 0x31a   : > { %v1431_v61 = vpack.c.bf16 %v1227_v57, %v1227_v57  ;;  %v1222_v62 = vadd.f32 %v1421_v46, %v1213_v58 }
 0x31c   : > { %1238 = vst.msk [vmem:[%s406_s15] sm:$0xf] %vm1237_vm9, %v1431_v61  ;;  %v1228_v63 = vadd.f32 %v1436_v59, %v1222_v62 }
 0x31e   : > { %v1432_v1 = vpack.c.bf16 %v1228_v63, %v1228_v63 }
 0x320   : > { %1239 = vst.msk [vmem:[%s406_s15 + $0x4] sm:$0xf] %vm1237_vm9, %v1432_v1 }
 0x321 PF: > { %s17_s26 = sadd.s32 1, %s1630_s26   ;;  %s1862_s24 = smov %s1626_s25 }
 0x322   : > { %p14_p5 = scmp.ge.s32.totalorder %s17_s26, 4   ;;  %s1863_s25 = smov %s1865_s27 }
 0x324   :  { %16 = sbr.rel (!%p14_p5) target bundleno = 2 (0x2), region = 90 }

// kernel: gpt_lm_forward.15
= control target key start
LH: loop header
LB: loop body
LE: loop exit
PB: predicated region body
PF: predicated region fallthrough
CT: control target
= control target key end

     0   :  { %7 = vsyncpa [#allocation3], 0  ;;  %s745_s0 = inlined_call_operand.vmem [shape: bf16[2,16,64], index: 0, kind: input, shape index: {}]   ;;  %s746_s1 = inlined_call_operand.vmem [shape: bf16[64,128], index: 1, kind: input, shape index: {}]   ;;  %s747_s2 = inlined_call_operand.hbm [shape: bf16[2,16,128], index: 2, kind: output, shape index: {}]  }
   0x1   :  { %9 = vsyncpa [#allocation3 + $0x1], 0  ;;  %s619_s9 = smov 0   ;;  %s621_s10 = smov 0  }
   0x2   :  { %s623_s11 = smov 0   ;;  %s625_s12 = smov 0  }
   0x3   :  { %s627_s13 = smov 0   ;;  %s629_s14 = smov 0  }
   0x4 LB: > { %s409_s15 = sadd.s32 4294967295, %s597_s14   ;;  %s410_s16 = sadd.s32 4294967294, %s597_s14   ;;  %s597_s14 = sphi %s629_s14, %s15_s14   ;;  %s593_s13 = sphi %s627_s13, %s754_s13   ;;  %s589_s12 = sphi %s625_s12, %s753_s12   ;;  %s585_s11 = sphi %s623_s11, %s752_s11   ;;  %s581_s10 = sphi %s621_s10, %s751_s10   ;;  %s577_s9 = sphi %s619_s9, %s750_s9  }
   0x5   : > { %s30_s17 = sadd.s32 1, %s593_s13  ;;  %s99_s18 = sadd.s32 1, %s585_s11 }
   0x6   : > { %p32_p0 = scmp.ge.s32.totalorder %s30_s17, 2  ;;  %p109_p1 = scmp.ne.s32.totalorder %s585_s11, %s581_s10 }
   0x7   : > { %p110_p2 = scmp.eq.s32.totalorder %s409_s15, 1  ;;  %p115_p3 = scmp.ne.s32.totalorder %s581_s10, %s577_s9 }
   0x8   : > { %s756_s17 = smov (%p32_p0, %s30_s17), 0  ;;  %p116_p5 = scmp.eq.s32.totalorder %s410_s16, 1 }
   0x9   : > { %p659_p4 = por %p110_p2, %p109_p1  ;;  %s92_s20 = ssub.s32 %s593_s13, %s756_s17 }
   0xa   : > { %p414_p6 = scmp.ge.s32.totalorder %s597_s14, 1  ;;  %p97_p7 = scmp.eq.s32.totalorder %s92_s20, 0 }
   0xb   : > { %p666_p8 = por %p116_p5, %p115_p3  ;;  %p154_p9 = scmp.lt.s32.totalorder %s597_s14, 3 }
   0xc   : > { %s672_s22 = scalar_select %p97_p7, %s585_s11, %s99_s18  }
   0xd   : > { %p155_p10 = pnand %p414_p6, %p154_p9 }
   0xe   : > { %p185_p11 = scmp.lt.s32.totalorder (!%p155_p10), %s589_s12, 1  ;;  %s181_s8 = sand.u32 (!%p155_p10), 1, %s581_s10  }
   0xf   : > { %158 = sbr.rel (%p155_p10) target bundleno = 250 (0xfa), region = 28  ;;  %s415_s15 = sshll.u32 (!%p155_p10), %s181_s8, 3 }
  0x10   : > { %s183_s16 = scalar_lea.vmem (!%p155_p10), [#allocation2], %s415_s15  ;;  %s434_s20 = sshll.u32 (!%p155_p10), %s589_s12, 7 }
  0x11   : > { %s311_s18 = sshll.u32 (!%p155_p10), %s183_s16, 4  ;;  %s698_s25 = scalar_lea.hbm (!%p155_p10), %s747_s2, %s434_s20  ;;  %s693_s18 = int_to_ptr.vmem [resolvable:$true] %s311_s18 }
  0x12   : > { %s700_s26 = scalar_lea.sflag (!%p155_p10), [#allocation3], %s181_s8 }
  0x14   : > { %v516_v0 = vld [vmem:[%s746_s1 + $0x18] sm:$0xff]   ;;  %v599_v1 = vmov 0.0   ;;  %v517_v2 = vld [vmem:[%s746_s1 + $0x10] sm:$0xff]   ;;  %vm600_vm0 = vmmov 0   ;;  %s186_s27 = scalar_select %p185_p11, %s589_s12, 1  ;;  %v518_v3 = vld [vmem:[%s746_s1 + $0x8] sm:$0xff]  }
  0x15   : > { %445 = vmatprep.subr.bf16.mxu0 %v599_v1  ;;  %453 = vmatprep.mubr.msk.bf16.mxu0 %vm600_vm0, %v599_v1  ;;  %v519_v4 = vld [vmem:[%s746_s1] sm:$0xff]   ;;  %vm239_vm1 = vcmask 523264   ;;  %s601_s12 = smov [#allocation2]  }
  0x16   : > { %446 = vmatpush3.bf16.msra.mxu0 %v516_v0  ;;  %s431_s30 = sshll.u32 %s186_s27, 3  ;;  %s521_s27 = scalar_lea.vmem %s693_s18, 128 }
  0x17   : > { %447 = vmatprep.subr.bf16.mxu0 %v599_v1  ;;  %s192_s5 = scalar_lea.vmem %s745_s0, %s431_s30  ;;  %p522_p12 = scmp.ne.s32.totalorder %s693_s18, %s521_s27 }
  0x18   : > { %v520_v5 = vld [vmem:[%s192_s5] sm:$0xff]   ;;  %s525_s28 = sshll.u32 %s601_s12, 4  ;;  %s526_s28 = int_to_ptr.vmem [resolvable:$false] %s525_s28 }
  0x19   : > { %p523_p13 = pnand %p522_p12, %p659_p4  ;;  %s527_s29 = scalar_lea.vmem %s526_s28, 256 }
  0x1a   : > { %448 = vmatpush3.bf16.msra.mxu0 %v517_v2  ;;  %p528_p1 = scmp.lt.s32.totalorder %s693_s18, %s526_s28  ;;  %p529_p2 = scmp.lt.s32.totalorder %s527_s29, %s521_s27 }
  0x1b   : > { %449 = vmatprep.subr.bf16.mxu0 %v599_v1  ;;  %p524_p0 = pneg %p523_p13 }
  0x1c   : > { %p530_p3 = por %p529_p2, %p528_p1 }
  0x1e   : > { %450 = vmatpush3.bf16.msra.mxu0 %v518_v3  ;;  %p531_p5 = pnand %p530_p3, %p524_p0 }
  0x1f   : > { %451 = vmatprep.subr.bf16.mxu0 %v599_v1 }
  0x22   : > { %452 = vmatpush3.bf16.msra.mxu0 %v519_v4 }
  0x25   : > { %454 = vmatmul.mubr.msk.bf16.vlgmr.msra.gmra.mxu0 %vm239_vm1, %v520_v5 }
  0xe5   : > { %v277_v6 = vpop.f32.mrf.mxu0 }
  0xe7   : > { %v455_v7 = vpop.f32.mrf.mxu0 }
  0xe9   : > { %v280_v8 = vpop.f32.mrf.mxu0 }
  0xea   : > { %v438_v9 = vpack.c.bf16 %v280_v8, %v277_v6 }
  0xeb   : > { %v456_v10 = vpop.f32.mrf.mxu0 }
  0xec   : > { %439 = vst [vmem:[%s183_s16] sm:$0xff] %v438_v9  }
  0xed   : > { %534 = shalt.err (!%p531_p5)
}
  0xee   : > { %s535_s30 = scalar_lea.hbm %s698_s25, 128  ;;  %s539_s5 = scalar_lea.hbm %s747_s2, 256 }
  0xef   : > { %p536_p6 = scmp.ne.s32.totalorder %s698_s25, %s535_s30  ;;  %p540_p10 = scmp.lt.s32.totalorder %s698_s25, %s747_s2 }
  0xf0   : > { %p541_p11 = scmp.lt.s32.totalorder %s539_s5, %s535_s30 }
  0xf1   : > { %p537_p7 = pnand %p536_p6, %p659_p4 }
  0xf2   : > { %p542_p12 = por %p541_p11, %p540_p10 }
  0xf3   : > { %p538_p9 = pneg %p537_p7 }
  0xf5   : > { %p543_p13 = pnand %p542_p12, %p538_p9 }
  0xf7   : > { %546 = shalt.err (!%p543_p13)
}
  0xf8   : > { %s602_s8 = smov 64   ;;  %s603_s15 = smov 4  }
  0xf9   : > { %457 = dma.vmem_to_hbm [thread:$0]  (%p659_p4), %s693_s18, 128, %s698_s25, %s700_s26, %s602_s8, %s602_s8, %s603_s15  }
  0xfa PF: > { %p463_p0 = scmp.ge.s32.totalorder %s597_s14, 2  ;;  %s326_s16 = sand.u32 1, %s577_s9  }
  0xfb   : > { %s327_s20 = scalar_lea.sflag [#allocation3], %s326_s16 }
  0xfc   : > { %p460_p1 = pnand %p463_p0, %p666_p8 }
  0xfe   : > { %p461_p2 = pneg %p460_p1 }
 0x100   : > { %572 = dma.done.wait (%p461_p2), %s327_s20, 128  }
 0x101   : > { %574 = vsyncadd (%p461_p2), %s327_s20, 4294967168  ;;  %s15_s14 = sadd.s32 1, %s597_s14   ;;  %s750_s9 = smov %s581_s10 }
 0x102   : > { %p12_p3 = scmp.ge.s32.totalorder %s15_s14, 4   ;;  %s751_s10 = smov %s585_s11 }
 0x103   : > { %s752_s11 = smov %s672_s22  ;;  %s753_s12 = smov %s593_s13 }
 0x104   : > { %s754_s13 = smov %s756_s17  ;;  %14 = sbr.rel (!%p12_p3) target bundleno = 4 (0x4), region = 66 }
 0x109   :  { %332 = vsyncpa [#allocation3], 1 }
 0x10a   :  { %334 = vsyncpa [#allocation3 + $0x1], 1 }

</bundles_post_ra>
